<compile_context>
chip_gen: v7x
topology: tpu7x:2x2x1
jax: 0.10.0
libtpu: 0.0.40
codegen_flags: <defaults>
</compile_context>

<pallas_src>
import math
import functools

import jax
import jax.numpy as jnp
from jax.experimental import pallas as pl
from jax.experimental.pallas import tpu as pltpu

EPS = 1e-6


def _layer_norm(v, scale, bias):
    # Matches the module's custom LayerNorm: torch.std uses Bessel's correction
    # (ddof=1) and eps is added to std (NOT to var).  Exact divide here (LN
    # feeds the residual stream); the cheap approx reciprocal is reserved for
    # the softmax denominator.
    mean = jnp.mean(v, axis=-1, keepdims=True)
    var = jnp.sum((v - mean) ** 2, axis=-1, keepdims=True) * (1.0 / (v.shape[-1] - 1))
    return (v - mean) / (jnp.sqrt(var) + EPS) * scale + bias


def encoder_layer_kernel(num_heads,
                         x_ref, wqkv_ref, bqkv_ref, wo_ref, w1_ref, b1_ref,
                         w2_ref, vecs_ref, out_ref, ctx_ref):
    x3 = x_ref[...]                                   # (Bt, L, H) f32
    Bt, L, H = x3.shape
    dh = H // num_heads
    R = Bt * L

    # Fold (Bt, L) -> rows; all row-wise math (LN, projections, FFN) runs on
    # one tall 2-D operand.  Residual stream stays f32 throughout.
    x = x3.reshape(R, H).astype(jnp.float32)

    vecs = vecs_ref[...]                              # (6, H) packed f32 vectors
    ln1_s, ln1_b = vecs[0:1, :], vecs[1:2, :]
    ln2_s, ln2_b = vecs[2:3, :], vecs[3:4, :]
    bo, b2 = vecs[4:5, :], vecs[5:6, :]

    # ---- pre-norm + fused QKV projection (one wide bf16 MXU pass) ----
    # 1/sqrt(dh) is already folded into the Q columns of wqkv/bqkv.
    h1 = _layer_norm(x, ln1_s, ln1_b)
    qkv = jnp.dot(h1.astype(jnp.bfloat16), wqkv_ref[...],
                  preferred_element_type=jnp.float32) + bqkv_ref[...]
    q = qkv[:, 0:H].astype(jnp.bfloat16)
    k = qkv[:, H:2 * H].astype(jnp.bfloat16)
    v = qkv[:, 2 * H:3 * H].astype(jnp.bfloat16)

    # ---- multi-head self-attention ----
    # Static head loop (static lane slices); each head does batched-over-Bt
    # bf16 matmuls and writes its context into its lane slice of the (R, H)
    # VMEM scratch.  Only q/k/v and the scratch ref are live across head
    # iterations, so vreg pressure stays bounded.
    # TODO(synk): when Mosaic supports the (Bt,L,nh,dh)->(Bt,nh,L,dh) relayout
    # cheaply, fold heads into the dot_general batch dim for one MXU stream;
    # for long sequences (L >= 1024) stream the KV axis with an online softmax
    # so the (Bt, L, L) logits never fully materialize.
    for h in range(num_heads):
        lo = h * dh
        qh = q[:, lo:lo + dh].reshape(Bt, L, dh)
        kh = k[:, lo:lo + dh].reshape(Bt, L, dh)
        vh = v[:, lo:lo + dh].reshape(Bt, L, dh)
        # logits = qh @ kh^T, batched over Bt -> (Bt, L, L), f32 accumulation
        logits = jax.lax.dot_general(qh, kh, (((2,), (2,)), ((0,), (0,))),
                                     preferred_element_type=jnp.float32)
        m = jnp.max(logits, axis=-1, keepdims=True)
        p = jnp.exp(logits - m)                        # f32 softmax math
        attn = p * pl.reciprocal(jnp.sum(p, axis=-1, keepdims=True), approx=True)
        # ctx = attn @ vh, batched over Bt -> (Bt, L, dh)
        ctx = jax.lax.dot_general(attn.astype(jnp.bfloat16), vh,
                                  (((2,), (1,)), ((0,), (0,))),
                                  preferred_element_type=jnp.float32)
        ctx_ref[:, lo:lo + dh] = ctx.reshape(R, dh)

    # ---- output projection: ONE full-depth (K = H) matmul + residual ----
    x2 = jnp.dot(ctx_ref[...].astype(jnp.bfloat16), wo_ref[...],
                 preferred_element_type=jnp.float32) + bo + x

    # ---- pre-norm + FFN (bf16 operands, f32 accumulation) ----
    h2 = _layer_norm(x2, ln2_s, ln2_b)
    t = jnp.maximum(
        jnp.dot(h2.astype(jnp.bfloat16), w1_ref[...],
                preferred_element_type=jnp.float32) + b1_ref[...], 0.0)
    ffn = jnp.dot(t.astype(jnp.bfloat16), w2_ref[...],
                  preferred_element_type=jnp.float32) + b2

    out_ref[...] = (ffn + x2).reshape(Bt, L, H).astype(out_ref.dtype)


def encoder_layer(x, params, num_heads, batch_tile=None):
    B, L, H = x.shape
    nh = num_heads
    dh = H // nh
    F = params["w1"].shape[1]
    scale = 1.0 / math.sqrt(dh)

    # --- pack parameters in the wrapper (cheap one-time XLA work) ---
    # * Q/K/V weights fused into one (H, 3H) matrix; 1/sqrt(dh) folded into the
    #   Q columns and Q bias so the kernel never scales q.
    # * Matmul weights cast to bfloat16 (MXU native); biases / LN vectors f32.
    wqkv = jnp.concatenate([params["wq"] * scale, params["wk"], params["wv"]],
                           axis=1).astype(jnp.bfloat16)            # (H, 3H) bf16
    bqkv = jnp.concatenate([params["bq"] * scale, params["bk"], params["bv"]],
                           axis=1).astype(jnp.float32)             # (1, 3H) f32
    wo = params["wo"].astype(jnp.bfloat16)                         # (H, H)  bf16
    w1 = params["w1"].astype(jnp.bfloat16)                         # (H, F)  bf16
    w2 = params["w2"].astype(jnp.bfloat16)                         # (F, H)  bf16
    b1 = params["b1"].astype(jnp.float32)                          # (1, F)  f32
    vecs = jnp.concatenate([params["ln1_scale"], params["ln1_bias"],
                            params["ln2_scale"], params["ln2_bias"],
                            params["bo"], params["b2"]],
                           axis=0).astype(jnp.float32)             # (6, H)  f32

    if batch_tile is None:
        # Biggest divisor of B that keeps rows-per-step (Bt*L) healthy, capped
        # at B//2 so the grid has >= 2 steps (v7x has 2 TensorCores; a 1-step
        # 'parallel' grid would idle one; negligible overhead on v5e/v6e).
        max_bt = B if B == 1 else max(1, B // 2)
        batch_tile = 1
        for cand in range(max_bt, 0, -1):
            if B % cand == 0 and cand * L <= 1024:
                batch_tile = cand
                break
    Bt = batch_tile
    assert B % Bt == 0

    plist = [wqkv, bqkv, wo, w1, b1, w2, vecs]

    def full_spec(p):
        return pl.BlockSpec(p.shape, lambda b, nd=p.ndim: (0,) * nd)

    # Explicit VMEM budget: weights (double-buffered by the constant index_map),
    # double-buffered activation blocks, the ctx scratch and the large in-kernel
    # temporaries, plus headroom.  Clamped to 64 MiB (v7x physical VMEM); v5e's
    # default scoped limit (~16 MiB) would otherwise bite first.
    def nbytes(a):
        return int(a.size) * a.dtype.itemsize
    R = Bt * L
    param_bytes = sum(nbytes(p) for p in plist)
    act_bytes = (4 * R * H * 4            # in/out blocks, double-buffered
                 + R * H * 4              # ctx scratch
                 + R * 3 * H * 4          # qkv
                 + R * F * 4              # FFN hidden activation
                 + 4 * Bt * L * L * 4     # logits / p / attn headroom
                 + 4 * R * H * 4)         # h1 / h2 / x2 / ffn temporaries
    vmem_limit = int(min(max(2 * param_bytes + act_bytes + (4 << 20), 8 << 20),
                         64 << 20))

    # TODO(synk): for H/F so large that even bf16 weights blow this budget
    # (v7x: 64 MiB), add a reduction grid axis tiling w1/w2 over F with a
    # (Bt*L, H) accumulator scratch + pl.when init/finalize, or keep the big
    # weights in memory_space=pl.ANY and DMA them once to avoid 2x buffering.
    return pl.pallas_call(
        functools.partial(encoder_layer_kernel, num_heads),
        out_shape=jax.ShapeDtypeStruct((B, L, H), x.dtype),
        grid=(B // Bt,),
        in_specs=[pl.BlockSpec((Bt, L, H), lambda b: (b, 0, 0))]
                 + [full_spec(p) for p in plist],
        out_specs=pl.BlockSpec((Bt, L, H), lambda b: (b, 0, 0)),
        scratch_shapes=[pltpu.VMEM((Bt * L, H), jnp.float32)],
        compiler_params=pltpu.CompilerParams(
            dimension_semantics=("parallel",),
            vmem_limit_bytes=vmem_limit),
    )(x, *plist)


def _reference(x, params, num_heads):
    """Pure-JAX (f32) reference mirroring the PyTorch forward (eval mode)."""
    def ln(v, s, b):
        mean = jnp.mean(v, axis=-1, keepdims=True)
        var = jnp.sum((v - mean) ** 2, axis=-1, keepdims=True) / (v.shape[-1] - 1)
        return (v - mean) / (jnp.sqrt(var) + EPS) * s + b

    B, L, H = x.shape
    dh = H // num_heads
    h1 = ln(x, params["ln1_scale"], params["ln1_bias"])
    q = h1 @ params["wq"] + params["bq"]
    k = h1 @ params["wk"] + params["bk"]
    v = h1 @ params["wv"] + params["bv"]
    q = q.reshape(B, L, num_heads, dh).transpose(0, 2, 1, 3) / math.sqrt(dh)
    k = k.reshape(B, L, num_heads, dh).transpose(0, 2, 1, 3)
    v = v.reshape(B, L, num_heads, dh).transpose(0, 2, 1, 3)
    logits = jnp.einsum("bhqd,bhkd->bhqk", q, k)
    attn = jax.nn.softmax(logits, axis=-1)
    ctx = jnp.einsum("bhqk,bhkd->bhqd", attn, v)
    ctx = ctx.transpose(0, 2, 1, 3).reshape(B, L, H)
    x2 = ctx @ params["wo"] + params["bo"] + x
    h2 = ln(x2, params["ln2_scale"], params["ln2_bias"])
    t = jax.nn.relu(h2 @ params["w1"] + params["b1"])
    return t @ params["w2"] + params["b2"] + x2


if __name__ == "__main__":
    B, L, H, F = 2, 8, 32, 64
    NUM_HEADS = 8

    key = jax.random.PRNGKey(0)
    keys = jax.random.split(key, 16)

    def dense(k, shape):
        return (0.02 * jax.random.normal(k, shape)).astype(jnp.float32)

    params = {
        "ln1_scale": jnp.ones((1, H), jnp.float32),
        "ln1_bias":  jnp.zeros((1, H), jnp.float32),
        "wq": dense(keys[0], (H, H)), "bq": dense(keys[1], (1, H)),
        "wk": dense(keys[2], (H, H)), "bk": dense(keys[3], (1, H)),
        "wv": dense(keys[4], (H, H)), "bv": dense(keys[5], (1, H)),
        "wo": dense(keys[6], (H, H)), "bo": dense(keys[7], (1, H)),
        "ln2_scale": jnp.ones((1, H), jnp.float32),
        "ln2_bias":  jnp.zeros((1, H), jnp.float32),
        "w1": dense(keys[8], (H, F)), "b1": dense(keys[9], (1, F)),
        "w2": dense(keys[10], (F, H)), "b2": dense(keys[11], (1, H)),
    }

    x = jax.random.normal(keys[12], (B, L, H), jnp.float32)

    out = encoder_layer(x, params, NUM_HEADS)
    out = jax.block_until_ready(out)

    ref = _reference(x, params, NUM_HEADS)
    assert out.shape == (B, L, H)
    assert bool(jnp.all(jnp.isfinite(out)))
    # Tolerance accounts for bf16 matmul operands (f32 accumulation).
    assert jnp.allclose(out, ref, atol=2e-2, rtol=2e-2), \
        f"max abs diff = {float(jnp.max(jnp.abs(out - ref)))}"

    print("KERNEL_OK")
</pallas_src>

<mosaic_0001>
module attributes {stable_mosaic.version = 11 : i64} {
  func.func @encoder_layer_kernel(%arg0: i32, %arg1: memref<1x8x32xf32, #tpu.memory_space<vmem>>, %arg2: memref<32x96xbf16, #tpu.memory_space<vmem>>, %arg3: memref<1x96xf32, #tpu.memory_space<vmem>>, %arg4: memref<32x32xbf16, #tpu.memory_space<vmem>>, %arg5: memref<32x64xbf16, #tpu.memory_space<vmem>>, %arg6: memref<1x64xf32, #tpu.memory_space<vmem>>, %arg7: memref<64x32xbf16, #tpu.memory_space<vmem>>, %arg8: memref<6x32xf32, #tpu.memory_space<vmem>>, %arg9: memref<1x8x32xf32, #tpu.memory_space<vmem>>, %arg10: memref<8x32xf32, #tpu.memory_space<vmem>>) attributes {dimension_semantics = [#tpu.dimension_semantics<parallel>], iteration_bounds = array<i64: 2>, scalar_prefetch = 0 : i64, scratch_operands = 1 : i64, tpu.core_type = #tpu.core_type<tc>, window_params = [{transform_indices = @transform_0, window_bounds = array<i64: 1, 8, 32>}, {pipeline_mode = #tpu.pipeline_mode<synchronous>, transform_indices = @transform_1, window_bounds = array<i64: 32, 96>}, {pipeline_mode = #tpu.pipeline_mode<synchronous>, transform_indices = @transform_2, window_bounds = array<i64: 1, 96>}, {pipeline_mode = #tpu.pipeline_mode<synchronous>, transform_indices = @transform_3, window_bounds = array<i64: 32, 32>}, {pipeline_mode = #tpu.pipeline_mode<synchronous>, transform_indices = @transform_4, window_bounds = array<i64: 32, 64>}, {pipeline_mode = #tpu.pipeline_mode<synchronous>, transform_indices = @transform_5, window_bounds = array<i64: 1, 64>}, {pipeline_mode = #tpu.pipeline_mode<synchronous>, transform_indices = @transform_6, window_bounds = array<i64: 64, 32>}, {pipeline_mode = #tpu.pipeline_mode<synchronous>, transform_indices = @transform_7, window_bounds = array<i64: 6, 32>}, {transform_indices = @transform_8, window_bounds = array<i64: 1, 8, 32>}]} {
    %c0 = arith.constant 0 : index
    %c0_0 = arith.constant 0 : index
    %c0_1 = arith.constant 0 : index
    %0 = vector.load %arg1[%c0, %c0_0, %c0_1] : memref<1x8x32xf32, #tpu.memory_space<vmem>>, vector<1x8x32xf32>
    %1 = vector.shape_cast %0 : vector<1x8x32xf32> to vector<8x32xf32>
    %c0_2 = arith.constant 0 : index
    %c0_3 = arith.constant 0 : index
    %2 = vector.load %arg8[%c0_2, %c0_3] : memref<6x32xf32, #tpu.memory_space<vmem>>, vector<6x32xf32>
    %3 = vector.extract_strided_slice %2 {offsets = [0, 0], sizes = [1, 32], strides = [1, 1]} : vector<6x32xf32> to vector<1x32xf32>
    %4 = vector.extract_strided_slice %2 {offsets = [1, 0], sizes = [1, 32], strides = [1, 1]} : vector<6x32xf32> to vector<1x32xf32>
    %5 = vector.extract_strided_slice %2 {offsets = [2, 0], sizes = [1, 32], strides = [1, 1]} : vector<6x32xf32> to vector<1x32xf32>
    %6 = vector.extract_strided_slice %2 {offsets = [3, 0], sizes = [1, 32], strides = [1, 1]} : vector<6x32xf32> to vector<1x32xf32>
    %7 = vector.extract_strided_slice %2 {offsets = [4, 0], sizes = [1, 32], strides = [1, 1]} : vector<6x32xf32> to vector<1x32xf32>
    %8 = vector.extract_strided_slice %2 {offsets = [5, 0], sizes = [1, 32], strides = [1, 1]} : vector<6x32xf32> to vector<1x32xf32>
    %cst = arith.constant dense<0.000000e+00> : vector<8xf32>
    %9 = vector.multi_reduction <add>, %1, %cst [1] : vector<8x32xf32> to vector<8xf32>
    %10 = vector.shape_cast %9 : vector<8xf32> to vector<8x1xf32>
    %cst_4 = arith.constant 3.200000e+01 : f32
    %11 = vector.broadcast %cst_4 : f32 to vector<8x1xf32>
    %12 = arith.divf %10, %11 : vector<8x1xf32>
    %13 = vector.broadcast %12 : vector<8x1xf32> to vector<8x32xf32>
    %14 = arith.subf %1, %13 : vector<8x32xf32>
    %15 = arith.mulf %14, %14 : vector<8x32xf32>
    %cst_5 = arith.constant dense<0.000000e+00> : vector<8xf32>
    %16 = vector.multi_reduction <add>, %15, %cst_5 [1] : vector<8x32xf32> to vector<8xf32>
    %17 = vector.shape_cast %16 : vector<8xf32> to vector<8x1xf32>
    %cst_6 = arith.constant 0.0322580636 : f32
    %18 = vector.broadcast %cst_6 : f32 to vector<8x1xf32>
    %19 = arith.mulf %17, %18 : vector<8x1xf32>
    %20 = vector.broadcast %12 : vector<8x1xf32> to vector<8x32xf32>
    %21 = arith.subf %1, %20 : vector<8x32xf32>
    %22 = math.sqrt %19 : vector<8x1xf32>
    %cst_7 = arith.constant 9.99999997E-7 : f32
    %23 = vector.broadcast %cst_7 : f32 to vector<8x1xf32>
    %24 = arith.addf %22, %23 : vector<8x1xf32>
    %25 = vector.broadcast %24 : vector<8x1xf32> to vector<8x32xf32>
    %26 = arith.divf %21, %25 : vector<8x32xf32>
    %27 = vector.broadcast %3 : vector<1x32xf32> to vector<8x32xf32>
    %28 = arith.mulf %26, %27 : vector<8x32xf32>
    %29 = vector.broadcast %4 : vector<1x32xf32> to vector<8x32xf32>
    %30 = arith.addf %28, %29 : vector<8x32xf32>
    %31 = arith.truncf %30 : vector<8x32xf32> to vector<8x32xbf16>
    %c0_8 = arith.constant 0 : index
    %c0_9 = arith.constant 0 : index
    %32 = vector.load %arg2[%c0_8, %c0_9] : memref<32x96xbf16, #tpu.memory_space<vmem>>, vector<32x96xbf16>
    %cst_10 = arith.constant dense<0.000000e+00> : vector<8x96xf32>
    %33 = tpu.matmul %31, %32, %cst_10 {dimension_numbers = #tpu.dot_dimension_numbers<[1], [0], [0], [1], [0, 0, 1, 1], [], []>} : vector<8x32xbf16>, vector<32x96xbf16>, vector<8x96xf32> -> vector<8x96xf32>
    %c0_11 = arith.constant 0 : index
    %c0_12 = arith.constant 0 : index
    %34 = vector.load %arg3[%c0_11, %c0_12] : memref<1x96xf32, #tpu.memory_space<vmem>>, vector<1x96xf32>
    %35 = vector.broadcast %34 : vector<1x96xf32> to vector<8x96xf32>
    %36 = arith.addf %33, %35 : vector<8x96xf32>
    %37 = vector.extract_strided_slice %36 {offsets = [0, 0], sizes = [8, 32], strides = [1, 1]} : vector<8x96xf32> to vector<8x32xf32>
    %38 = arith.truncf %37 : vector<8x32xf32> to vector<8x32xbf16>
    %39 = vector.extract_strided_slice %36 {offsets = [0, 32], sizes = [8, 32], strides = [1, 1]} : vector<8x96xf32> to vector<8x32xf32>
    %40 = arith.truncf %39 : vector<8x32xf32> to vector<8x32xbf16>
    %41 = vector.extract_strided_slice %36 {offsets = [0, 64], sizes = [8, 32], strides = [1, 1]} : vector<8x96xf32> to vector<8x32xf32>
    %42 = arith.truncf %41 : vector<8x32xf32> to vector<8x32xbf16>
    %43 = vector.extract_strided_slice %38 {offsets = [0, 0], sizes = [8, 4], strides = [1, 1]} : vector<8x32xbf16> to vector<8x4xbf16>
    %44 = vector.shape_cast %43 : vector<8x4xbf16> to vector<1x8x4xbf16>
    %45 = vector.extract_strided_slice %40 {offsets = [0, 0], sizes = [8, 4], strides = [1, 1]} : vector<8x32xbf16> to vector<8x4xbf16>
    %46 = vector.shape_cast %45 : vector<8x4xbf16> to vector<1x8x4xbf16>
    %47 = vector.extract_strided_slice %42 {offsets = [0, 0], sizes = [8, 4], strides = [1, 1]} : vector<8x32xbf16> to vector<8x4xbf16>
    %48 = vector.shape_cast %47 : vector<8x4xbf16> to vector<1x8x4xbf16>
    %cst_13 = arith.constant dense<0.000000e+00> : vector<1x8x8xf32>
    %49 = tpu.matmul %44, %46, %cst_13 {dimension_numbers = #tpu.dot_dimension_numbers<[2], [2], [1], [1], [0, 0, 0, 1, 1, 1], [0], [0]>} : vector<1x8x4xbf16>, vector<1x8x4xbf16>, vector<1x8x8xf32> -> vector<1x8x8xf32>
    %cst_14 = arith.constant dense<0xFF800000> : vector<1x8xf32>
    %50 = vector.multi_reduction <maximumf>, %49, %cst_14 [2] : vector<1x8x8xf32> to vector<1x8xf32>
    %51 = vector.shape_cast %50 : vector<1x8xf32> to vector<1x8x1xf32>
    %52 = vector.broadcast %51 : vector<1x8x1xf32> to vector<1x8x8xf32>
    %53 = arith.subf %49, %52 : vector<1x8x8xf32>
    %54 = math.exp %53 : vector<1x8x8xf32>
    %cst_15 = arith.constant dense<0.000000e+00> : vector<1x8xf32>
    %55 = vector.multi_reduction <add>, %54, %cst_15 [2] : vector<1x8x8xf32> to vector<1x8xf32>
    %56 = vector.shape_cast %55 : vector<1x8xf32> to vector<1x8x1xf32>
    %57 = tpu.reciprocal %56 {approx = true} : vector<1x8x1xf32> -> vector<1x8x1xf32>
    %58 = vector.broadcast %57 : vector<1x8x1xf32> to vector<1x8x8xf32>
    %59 = arith.mulf %54, %58 : vector<1x8x8xf32>
    %60 = arith.truncf %59 : vector<1x8x8xf32> to vector<1x8x8xbf16>
    %cst_16 = arith.constant dense<0.000000e+00> : vector<1x8x4xf32>
    %61 = tpu.matmul %60, %48, %cst_16 {dimension_numbers = #tpu.dot_dimension_numbers<[2], [1], [1], [2], [0, 0, 0, 1, 1, 2], [0], [0]>} : vector<1x8x8xbf16>, vector<1x8x4xbf16>, vector<1x8x4xf32> -> vector<1x8x4xf32>
    %62 = vector.shape_cast %61 : vector<1x8x4xf32> to vector<8x4xf32>
    %c0_17 = arith.constant 0 : index
    %c0_18 = arith.constant 0 : index
    %63 = vector.load %arg10[%c0_17, %c0_18] : memref<8x32xf32, #tpu.memory_space<vmem>>, vector<8x4xf32>
    tpu.vector_store %arg10[%c0_17, %c0_18], %62 {strides = array<i32>} : memref<8x32xf32, #tpu.memory_space<vmem>>, vector<8x4xf32>,
    %64 = vector.extract_strided_slice %38 {offsets = [0, 4], sizes = [8, 4], strides = [1, 1]} : vector<8x32xbf16> to vector<8x4xbf16>
    %65 = vector.shape_cast %64 : vector<8x4xbf16> to vector<1x8x4xbf16>
    %66 = vector.extract_strided_slice %40 {offsets = [0, 4], sizes = [8, 4], strides = [1, 1]} : vector<8x32xbf16> to vector<8x4xbf16>
    %67 = vector.shape_cast %66 : vector<8x4xbf16> to vector<1x8x4xbf16>
    %68 = vector.extract_strided_slice %42 {offsets = [0, 4], sizes = [8, 4], strides = [1, 1]} : vector<8x32xbf16> to vector<8x4xbf16>
    %69 = vector.shape_cast %68 : vector<8x4xbf16> to vector<1x8x4xbf16>
    %cst_19 = arith.constant dense<0.000000e+00> : vector<1x8x8xf32>
    %70 = tpu.matmul %65, %67, %cst_19 {dimension_numbers = #tpu.dot_dimension_numbers<[2], [2], [1], [1], [0, 0, 0, 1, 1, 1], [0], [0]>} : vector<1x8x4xbf16>, vector<1x8x4xbf16>, vector<1x8x8xf32> -> vector<1x8x8xf32>
    %cst_20 = arith.constant dense<0xFF800000> : vector<1x8xf32>
    %71 = vector.multi_reduction <maximumf>, %70, %cst_20 [2] : vector<1x8x8xf32> to vector<1x8xf32>
    %72 = vector.shape_cast %71 : vector<1x8xf32> to vector<1x8x1xf32>
    %73 = vector.broadcast %72 : vector<1x8x1xf32> to vector<1x8x8xf32>
    %74 = arith.subf %70, %73 : vector<1x8x8xf32>
    %75 = math.exp %74 : vector<1x8x8xf32>
    %cst_21 = arith.constant dense<0.000000e+00> : vector<1x8xf32>
    %76 = vector.multi_reduction <add>, %75, %cst_21 [2] : vector<1x8x8xf32> to vector<1x8xf32>
    %77 = vector.shape_cast %76 : vector<1x8xf32> to vector<1x8x1xf32>
    %78 = tpu.reciprocal %77 {approx = true} : vector<1x8x1xf32> -> vector<1x8x1xf32>
    %79 = vector.broadcast %78 : vector<1x8x1xf32> to vector<1x8x8xf32>
    %80 = arith.mulf %75, %79 : vector<1x8x8xf32>
    %81 = arith.truncf %80 : vector<1x8x8xf32> to vector<1x8x8xbf16>
    %cst_22 = arith.constant dense<0.000000e+00> : vector<1x8x4xf32>
    %82 = tpu.matmul %81, %69, %cst_22 {dimension_numbers = #tpu.dot_dimension_numbers<[2], [1], [1], [2], [0, 0, 0, 1, 1, 2], [0], [0]>} : vector<1x8x8xbf16>, vector<1x8x4xbf16>, vector<1x8x4xf32> -> vector<1x8x4xf32>
    %83 = vector.shape_cast %82 : vector<1x8x4xf32> to vector<8x4xf32>
    %c0_23 = arith.constant 0 : index
    %c4 = arith.constant 4 : index
    %84 = vector.load %arg10[%c0_23, %c4] : memref<8x32xf32, #tpu.memory_space<vmem>>, vector<8x4xf32>
    tpu.vector_store %arg10[%c0_23, %c4], %83 {strides = array<i32>} : memref<8x32xf32, #tpu.memory_space<vmem>>, vector<8x4xf32>,
    %85 = vector.extract_strided_slice %38 {offsets = [0, 8], sizes = [8, 4], strides = [1, 1]} : vector<8x32xbf16> to vector<8x4xbf16>
    %86 = vector.shape_cast %85 : vector<8x4xbf16> to vector<1x8x4xbf16>
    %87 = vector.extract_strided_slice %40 {offsets = [0, 8], sizes = [8, 4], strides = [1, 1]} : vector<8x32xbf16> to vector<8x4xbf16>
    %88 = vector.shape_cast %87 : vector<8x4xbf16> to vector<1x8x4xbf16>
    %89 = vector.extract_strided_slice %42 {offsets = [0, 8], sizes = [8, 4], strides = [1, 1]} : vector<8x32xbf16> to vector<8x4xbf16>
    %90 = vector.shape_cast %89 : vector<8x4xbf16> to vector<1x8x4xbf16>
    %cst_24 = arith.constant dense<0.000000e+00> : vector<1x8x8xf32>
    %91 = tpu.matmul %86, %88, %cst_24 {dimension_numbers = #tpu.dot_dimension_numbers<[2], [2], [1], [1], [0, 0, 0, 1, 1, 1], [0], [0]>} : vector<1x8x4xbf16>, vector<1x8x4xbf16>, vector<1x8x8xf32> -> vector<1x8x8xf32>
    %cst_25 = arith.constant dense<0xFF800000> : vector<1x8xf32>
    %92 = vector.multi_reduction <maximumf>, %91, %cst_25 [2] : vector<1x8x8xf32> to vector<1x8xf32>
    %93 = vector.shape_cast %92 : vector<1x8xf32> to vector<1x8x1xf32>
    %94 = vector.broadcast %93 : vector<1x8x1xf32> to vector<1x8x8xf32>
    %95 = arith.subf %91, %94 : vector<1x8x8xf32>
    %96 = math.exp %95 : vector<1x8x8xf32>
    %cst_26 = arith.constant dense<0.000000e+00> : vector<1x8xf32>
    %97 = vector.multi_reduction <add>, %96, %cst_26 [2] : vector<1x8x8xf32> to vector<1x8xf32>
    %98 = vector.shape_cast %97 : vector<1x8xf32> to vector<1x8x1xf32>
    %99 = tpu.reciprocal %98 {approx = true} : vector<1x8x1xf32> -> vector<1x8x1xf32>
    %100 = vector.broadcast %99 : vector<1x8x1xf32> to vector<1x8x8xf32>
    %101 = arith.mulf %96, %100 : vector<1x8x8xf32>
    %102 = arith.truncf %101 : vector<1x8x8xf32> to vector<1x8x8xbf16>
    %cst_27 = arith.constant dense<0.000000e+00> : vector<1x8x4xf32>
    %103 = tpu.matmul %102, %90, %cst_27 {dimension_numbers = #tpu.dot_dimension_numbers<[2], [1], [1], [2], [0, 0, 0, 1, 1, 2], [0], [0]>} : vector<1x8x8xbf16>, vector<1x8x4xbf16>, vector<1x8x4xf32> -> vector<1x8x4xf32>
    %104 = vector.shape_cast %103 : vector<1x8x4xf32> to vector<8x4xf32>
    %c0_28 = arith.constant 0 : index
    %c8 = arith.constant 8 : index
    %105 = vector.load %arg10[%c0_28, %c8] : memref<8x32xf32, #tpu.memory_space<vmem>>, vector<8x4xf32>
    tpu.vector_store %arg10[%c0_28, %c8], %104 {strides = array<i32>} : memref<8x32xf32, #tpu.memory_space<vmem>>, vector<8x4xf32>,
    %106 = vector.extract_strided_slice %38 {offsets = [0, 12], sizes = [8, 4], strides = [1, 1]} : vector<8x32xbf16> to vector<8x4xbf16>
    %107 = vector.shape_cast %106 : vector<8x4xbf16> to vector<1x8x4xbf16>
    %108 = vector.extract_strided_slice %40 {offsets = [0, 12], sizes = [8, 4], strides = [1, 1]} : vector<8x32xbf16> to vector<8x4xbf16>
    %109 = vector.shape_cast %108 : vector<8x4xbf16> to vector<1x8x4xbf16>
    %110 = vector.extract_strided_slice %42 {offsets = [0, 12], sizes = [8, 4], strides = [1, 1]} : vector<8x32xbf16> to vector<8x4xbf16>
    %111 = vector.shape_cast %110 : vector<8x4xbf16> to vector<1x8x4xbf16>
    %cst_29 = arith.constant dense<0.000000e+00> : vector<1x8x8xf32>
    %112 = tpu.matmul %107, %109, %cst_29 {dimension_numbers = #tpu.dot_dimension_numbers<[2], [2], [1], [1], [0, 0, 0, 1, 1, 1], [0], [0]>} : vector<1x8x4xbf16>, vector<1x8x4xbf16>, vector<1x8x8xf32> -> vector<1x8x8xf32>
    %cst_30 = arith.constant dense<0xFF800000> : vector<1x8xf32>
    %113 = vector.multi_reduction <maximumf>, %112, %cst_30 [2] : vector<1x8x8xf32> to vector<1x8xf32>
    %114 = vector.shape_cast %113 : vector<1x8xf32> to vector<1x8x1xf32>
    %115 = vector.broadcast %114 : vector<1x8x1xf32> to vector<1x8x8xf32>
    %116 = arith.subf %112, %115 : vector<1x8x8xf32>
    %117 = math.exp %116 : vector<1x8x8xf32>
    %cst_31 = arith.constant dense<0.000000e+00> : vector<1x8xf32>
    %118 = vector.multi_reduction <add>, %117, %cst_31 [2] : vector<1x8x8xf32> to vector<1x8xf32>
    %119 = vector.shape_cast %118 : vector<1x8xf32> to vector<1x8x1xf32>
    %120 = tpu.reciprocal %119 {approx = true} : vector<1x8x1xf32> -> vector<1x8x1xf32>
    %121 = vector.broadcast %120 : vector<1x8x1xf32> to vector<1x8x8xf32>
    %122 = arith.mulf %117, %121 : vector<1x8x8xf32>
    %123 = arith.truncf %122 : vector<1x8x8xf32> to vector<1x8x8xbf16>
    %cst_32 = arith.constant dense<0.000000e+00> : vector<1x8x4xf32>
    %124 = tpu.matmul %123, %111, %cst_32 {dimension_numbers = #tpu.dot_dimension_numbers<[2], [1], [1], [2], [0, 0, 0, 1, 1, 2], [0], [0]>} : vector<1x8x8xbf16>, vector<1x8x4xbf16>, vector<1x8x4xf32> -> vector<1x8x4xf32>
    %125 = vector.shape_cast %124 : vector<1x8x4xf32> to vector<8x4xf32>
    %c0_33 = arith.constant 0 : index
    %c12 = arith.constant 12 : index
    %126 = vector.load %arg10[%c0_33, %c12] : memref<8x32xf32, #tpu.memory_space<vmem>>, vector<8x4xf32>
    tpu.vector_store %arg10[%c0_33, %c12], %125 {strides = array<i32>} : memref<8x32xf32, #tpu.memory_space<vmem>>, vector<8x4xf32>,
    %127 = vector.extract_strided_slice %38 {offsets = [0, 16], sizes = [8, 4], strides = [1, 1]} : vector<8x32xbf16> to vector<8x4xbf16>
    %128 = vector.shape_cast %127 : vector<8x4xbf16> to vector<1x8x4xbf16>
    %129 = vector.extract_strided_slice %40 {offsets = [0, 16], sizes = [8, 4], strides = [1, 1]} : vector<8x32xbf16> to vector<8x4xbf16>
    %130 = vector.shape_cast %129 : vector<8x4xbf16> to vector<1x8x4xbf16>
    %131 = vector.extract_strided_slice %42 {offsets = [0, 16], sizes = [8, 4], strides = [1, 1]} : vector<8x32xbf16> to vector<8x4xbf16>
    %132 = vector.shape_cast %131 : vector<8x4xbf16> to vector<1x8x4xbf16>
    %cst_34 = arith.constant dense<0.000000e+00> : vector<1x8x8xf32>
    %133 = tpu.matmul %128, %130, %cst_34 {dimension_numbers = #tpu.dot_dimension_numbers<[2], [2], [1], [1], [0, 0, 0, 1, 1, 1], [0], [0]>} : vector<1x8x4xbf16>, vector<1x8x4xbf16>, vector<1x8x8xf32> -> vector<1x8x8xf32>
    %cst_35 = arith.constant dense<0xFF800000> : vector<1x8xf32>
    %134 = vector.multi_reduction <maximumf>, %133, %cst_35 [2] : vector<1x8x8xf32> to vector<1x8xf32>
    %135 = vector.shape_cast %134 : vector<1x8xf32> to vector<1x8x1xf32>
    %136 = vector.broadcast %135 : vector<1x8x1xf32> to vector<1x8x8xf32>
    %137 = arith.subf %133, %136 : vector<1x8x8xf32>
    %138 = math.exp %137 : vector<1x8x8xf32>
    %cst_36 = arith.constant dense<0.000000e+00> : vector<1x8xf32>
    %139 = vector.multi_reduction <add>, %138, %cst_36 [2] : vector<1x8x8xf32> to vector<1x8xf32>
    %140 = vector.shape_cast %139 : vector<1x8xf32> to vector<1x8x1xf32>
    %141 = tpu.reciprocal %140 {approx = true} : vector<1x8x1xf32> -> vector<1x8x1xf32>
    %142 = vector.broadcast %141 : vector<1x8x1xf32> to vector<1x8x8xf32>
    %143 = arith.mulf %138, %142 : vector<1x8x8xf32>
    %144 = arith.truncf %143 : vector<1x8x8xf32> to vector<1x8x8xbf16>
    %cst_37 = arith.constant dense<0.000000e+00> : vector<1x8x4xf32>
    %145 = tpu.matmul %144, %132, %cst_37 {dimension_numbers = #tpu.dot_dimension_numbers<[2], [1], [1], [2], [0, 0, 0, 1, 1, 2], [0], [0]>} : vector<1x8x8xbf16>, vector<1x8x4xbf16>, vector<1x8x4xf32> -> vector<1x8x4xf32>
    %146 = vector.shape_cast %145 : vector<1x8x4xf32> to vector<8x4xf32>
    %c0_38 = arith.constant 0 : index
    %c16 = arith.constant 16 : index
    %147 = vector.load %arg10[%c0_38, %c16] : memref<8x32xf32, #tpu.memory_space<vmem>>, vector<8x4xf32>
    tpu.vector_store %arg10[%c0_38, %c16], %146 {strides = array<i32>} : memref<8x32xf32, #tpu.memory_space<vmem>>, vector<8x4xf32>,
    %148 = vector.extract_strided_slice %38 {offsets = [0, 20], sizes = [8, 4], strides = [1, 1]} : vector<8x32xbf16> to vector<8x4xbf16>
    %149 = vector.shape_cast %148 : vector<8x4xbf16> to vector<1x8x4xbf16>
    %150 = vector.extract_strided_slice %40 {offsets = [0, 20], sizes = [8, 4], strides = [1, 1]} : vector<8x32xbf16> to vector<8x4xbf16>
    %151 = vector.shape_cast %150 : vector<8x4xbf16> to vector<1x8x4xbf16>
    %152 = vector.extract_strided_slice %42 {offsets = [0, 20], sizes = [8, 4], strides = [1, 1]} : vector<8x32xbf16> to vector<8x4xbf16>
    %153 = vector.shape_cast %152 : vector<8x4xbf16> to vector<1x8x4xbf16>
    %cst_39 = arith.constant dense<0.000000e+00> : vector<1x8x8xf32>
    %154 = tpu.matmul %149, %151, %cst_39 {dimension_numbers = #tpu.dot_dimension_numbers<[2], [2], [1], [1], [0, 0, 0, 1, 1, 1], [0], [0]>} : vector<1x8x4xbf16>, vector<1x8x4xbf16>, vector<1x8x8xf32> -> vector<1x8x8xf32>
    %cst_40 = arith.constant dense<0xFF800000> : vector<1x8xf32>
    %155 = vector.multi_reduction <maximumf>, %154, %cst_40 [2] : vector<1x8x8xf32> to vector<1x8xf32>
    %156 = vector.shape_cast %155 : vector<1x8xf32> to vector<1x8x1xf32>
    %157 = vector.broadcast %156 : vector<1x8x1xf32> to vector<1x8x8xf32>
    %158 = arith.subf %154, %157 : vector<1x8x8xf32>
    %159 = math.exp %158 : vector<1x8x8xf32>
    %cst_41 = arith.constant dense<0.000000e+00> : vector<1x8xf32>
    %160 = vector.multi_reduction <add>, %159, %cst_41 [2] : vector<1x8x8xf32> to vector<1x8xf32>
    %161 = vector.shape_cast %160 : vector<1x8xf32> to vector<1x8x1xf32>
    %162 = tpu.reciprocal %161 {approx = true} : vector<1x8x1xf32> -> vector<1x8x1xf32>
    %163 = vector.broadcast %162 : vector<1x8x1xf32> to vector<1x8x8xf32>
    %164 = arith.mulf %159, %163 : vector<1x8x8xf32>
    %165 = arith.truncf %164 : vector<1x8x8xf32> to vector<1x8x8xbf16>
    %cst_42 = arith.constant dense<0.000000e+00> : vector<1x8x4xf32>
    %166 = tpu.matmul %165, %153, %cst_42 {dimension_numbers = #tpu.dot_dimension_numbers<[2], [1], [1], [2], [0, 0, 0, 1, 1, 2], [0], [0]>} : vector<1x8x8xbf16>, vector<1x8x4xbf16>, vector<1x8x4xf32> -> vector<1x8x4xf32>
    %167 = vector.shape_cast %166 : vector<1x8x4xf32> to vector<8x4xf32>
    %c0_43 = arith.constant 0 : index
    %c20 = arith.constant 20 : index
    %168 = vector.load %arg10[%c0_43, %c20] : memref<8x32xf32, #tpu.memory_space<vmem>>, vector<8x4xf32>
    tpu.vector_store %arg10[%c0_43, %c20], %167 {strides = array<i32>} : memref<8x32xf32, #tpu.memory_space<vmem>>, vector<8x4xf32>,
    %169 = vector.extract_strided_slice %38 {offsets = [0, 24], sizes = [8, 4], strides = [1, 1]} : vector<8x32xbf16> to vector<8x4xbf16>
    %170 = vector.shape_cast %169 : vector<8x4xbf16> to vector<1x8x4xbf16>
    %171 = vector.extract_strided_slice %40 {offsets = [0, 24], sizes = [8, 4], strides = [1, 1]} : vector<8x32xbf16> to vector<8x4xbf16>
    %172 = vector.shape_cast %171 : vector<8x4xbf16> to vector<1x8x4xbf16>
    %173 = vector.extract_strided_slice %42 {offsets = [0, 24], sizes = [8, 4], strides = [1, 1]} : vector<8x32xbf16> to vector<8x4xbf16>
    %174 = vector.shape_cast %173 : vector<8x4xbf16> to vector<1x8x4xbf16>
    %cst_44 = arith.constant dense<0.000000e+00> : vector<1x8x8xf32>
    %175 = tpu.matmul %170, %172, %cst_44 {dimension_numbers = #tpu.dot_dimension_numbers<[2], [2], [1], [1], [0, 0, 0, 1, 1, 1], [0], [0]>} : vector<1x8x4xbf16>, vector<1x8x4xbf16>, vector<1x8x8xf32> -> vector<1x8x8xf32>
    %cst_45 = arith.constant dense<0xFF800000> : vector<1x8xf32>
    %176 = vector.multi_reduction <maximumf>, %175, %cst_45 [2] : vector<1x8x8xf32> to vector<1x8xf32>
    %177 = vector.shape_cast %176 : vector<1x8xf32> to vector<1x8x1xf32>
    %178 = vector.broadcast %177 : vector<1x8x1xf32> to vector<1x8x8xf32>
    %179 = arith.subf %175, %178 : vector<1x8x8xf32>
    %180 = math.exp %179 : vector<1x8x8xf32>
    %cst_46 = arith.constant dense<0.000000e+00> : vector<1x8xf32>
    %181 = vector.multi_reduction <add>, %180, %cst_46 [2] : vector<1x8x8xf32> to vector<1x8xf32>
    %182 = vector.shape_cast %181 : vector<1x8xf32> to vector<1x8x1xf32>
    %183 = tpu.reciprocal %182 {approx = true} : vector<1x8x1xf32> -> vector<1x8x1xf32>
    %184 = vector.broadcast %183 : vector<1x8x1xf32> to vector<1x8x8xf32>
    %185 = arith.mulf %180, %184 : vector<1x8x8xf32>
    %186 = arith.truncf %185 : vector<1x8x8xf32> to vector<1x8x8xbf16>
    %cst_47 = arith.constant dense<0.000000e+00> : vector<1x8x4xf32>
    %187 = tpu.matmul %186, %174, %cst_47 {dimension_numbers = #tpu.dot_dimension_numbers<[2], [1], [1], [2], [0, 0, 0, 1, 1, 2], [0], [0]>} : vector<1x8x8xbf16>, vector<1x8x4xbf16>, vector<1x8x4xf32> -> vector<1x8x4xf32>
    %188 = vector.shape_cast %187 : vector<1x8x4xf32> to vector<8x4xf32>
    %c0_48 = arith.constant 0 : index
    %c24 = arith.constant 24 : index
    %189 = vector.load %arg10[%c0_48, %c24] : memref<8x32xf32, #tpu.memory_space<vmem>>, vector<8x4xf32>
    tpu.vector_store %arg10[%c0_48, %c24], %188 {strides = array<i32>} : memref<8x32xf32, #tpu.memory_space<vmem>>, vector<8x4xf32>,
    %190 = vector.extract_strided_slice %38 {offsets = [0, 28], sizes = [8, 4], strides = [1, 1]} : vector<8x32xbf16> to vector<8x4xbf16>
    %191 = vector.shape_cast %190 : vector<8x4xbf16> to vector<1x8x4xbf16>
    %192 = vector.extract_strided_slice %40 {offsets = [0, 28], sizes = [8, 4], strides = [1, 1]} : vector<8x32xbf16> to vector<8x4xbf16>
    %193 = vector.shape_cast %192 : vector<8x4xbf16> to vector<1x8x4xbf16>
    %194 = vector.extract_strided_slice %42 {offsets = [0, 28], sizes = [8, 4], strides = [1, 1]} : vector<8x32xbf16> to vector<8x4xbf16>
    %195 = vector.shape_cast %194 : vector<8x4xbf16> to vector<1x8x4xbf16>
    %cst_49 = arith.constant dense<0.000000e+00> : vector<1x8x8xf32>
    %196 = tpu.matmul %191, %193, %cst_49 {dimension_numbers = #tpu.dot_dimension_numbers<[2], [2], [1], [1], [0, 0, 0, 1, 1, 1], [0], [0]>} : vector<1x8x4xbf16>, vector<1x8x4xbf16>, vector<1x8x8xf32> -> vector<1x8x8xf32>
    %cst_50 = arith.constant dense<0xFF800000> : vector<1x8xf32>
    %197 = vector.multi_reduction <maximumf>, %196, %cst_50 [2] : vector<1x8x8xf32> to vector<1x8xf32>
    %198 = vector.shape_cast %197 : vector<1x8xf32> to vector<1x8x1xf32>
    %199 = vector.broadcast %198 : vector<1x8x1xf32> to vector<1x8x8xf32>
    %200 = arith.subf %196, %199 : vector<1x8x8xf32>
    %201 = math.exp %200 : vector<1x8x8xf32>
    %cst_51 = arith.constant dense<0.000000e+00> : vector<1x8xf32>
    %202 = vector.multi_reduction <add>, %201, %cst_51 [2] : vector<1x8x8xf32> to vector<1x8xf32>
    %203 = vector.shape_cast %202 : vector<1x8xf32> to vector<1x8x1xf32>
    %204 = tpu.reciprocal %203 {approx = true} : vector<1x8x1xf32> -> vector<1x8x1xf32>
    %205 = vector.broadcast %204 : vector<1x8x1xf32> to vector<1x8x8xf32>
    %206 = arith.mulf %201, %205 : vector<1x8x8xf32>
    %207 = arith.truncf %206 : vector<1x8x8xf32> to vector<1x8x8xbf16>
    %cst_52 = arith.constant dense<0.000000e+00> : vector<1x8x4xf32>
    %208 = tpu.matmul %207, %195, %cst_52 {dimension_numbers = #tpu.dot_dimension_numbers<[2], [1], [1], [2], [0, 0, 0, 1, 1, 2], [0], [0]>} : vector<1x8x8xbf16>, vector<1x8x4xbf16>, vector<1x8x4xf32> -> vector<1x8x4xf32>
    %209 = vector.shape_cast %208 : vector<1x8x4xf32> to vector<8x4xf32>
    %c0_53 = arith.constant 0 : index
    %c28 = arith.constant 28 : index
    %210 = vector.load %arg10[%c0_53, %c28] : memref<8x32xf32, #tpu.memory_space<vmem>>, vector<8x4xf32>
    tpu.vector_store %arg10[%c0_53, %c28], %209 {strides = array<i32>} : memref<8x32xf32, #tpu.memory_space<vmem>>, vector<8x4xf32>,
    %c0_54 = arith.constant 0 : index
    %c0_55 = arith.constant 0 : index
    %211 = vector.load %arg10[%c0_54, %c0_55] : memref<8x32xf32, #tpu.memory_space<vmem>>, vector<8x32xf32>
    %212 = arith.truncf %211 : vector<8x32xf32> to vector<8x32xbf16>
    %c0_56 = arith.constant 0 : index
    %c0_57 = arith.constant 0 : index
    %213 = vector.load %arg4[%c0_56, %c0_57] : memref<32x32xbf16, #tpu.memory_space<vmem>>, vector<32x32xbf16>
    %cst_58 = arith.constant dense<0.000000e+00> : vector<8x32xf32>
    %214 = tpu.matmul %212, %213, %cst_58 {dimension_numbers = #tpu.dot_dimension_numbers<[1], [0], [0], [1], [0, 0, 1, 1], [], []>} : vector<8x32xbf16>, vector<32x32xbf16>, vector<8x32xf32> -> vector<8x32xf32>
    %215 = vector.broadcast %7 : vector<1x32xf32> to vector<8x32xf32>
    %216 = arith.addf %214, %215 : vector<8x32xf32>
    %217 = arith.addf %216, %1 : vector<8x32xf32>
    %cst_59 = arith.constant dense<0.000000e+00> : vector<8xf32>
    %218 = vector.multi_reduction <add>, %217, %cst_59 [1] : vector<8x32xf32> to vector<8xf32>
    %219 = vector.shape_cast %218 : vector<8xf32> to vector<8x1xf32>
    %cst_60 = arith.constant 3.200000e+01 : f32
    %220 = vector.broadcast %cst_60 : f32 to vector<8x1xf32>
    %221 = arith.divf %219, %220 : vector<8x1xf32>
    %222 = vector.broadcast %221 : vector<8x1xf32> to vector<8x32xf32>
    %223 = arith.subf %217, %222 : vector<8x32xf32>
    %224 = arith.mulf %223, %223 : vector<8x32xf32>
    %cst_61 = arith.constant dense<0.000000e+00> : vector<8xf32>
    %225 = vector.multi_reduction <add>, %224, %cst_61 [1] : vector<8x32xf32> to vector<8xf32>
    %226 = vector.shape_cast %225 : vector<8xf32> to vector<8x1xf32>
    %cst_62 = arith.constant 0.0322580636 : f32
    %227 = vector.broadcast %cst_62 : f32 to vector<8x1xf32>
    %228 = arith.mulf %226, %227 : vector<8x1xf32>
    %229 = vector.broadcast %221 : vector<8x1xf32> to vector<8x32xf32>
    %230 = arith.subf %217, %229 : vector<8x32xf32>
    %231 = math.sqrt %228 : vector<8x1xf32>
    %cst_63 = arith.constant 9.99999997E-7 : f32
    %232 = vector.broadcast %cst_63 : f32 to vector<8x1xf32>
    %233 = arith.addf %231, %232 : vector<8x1xf32>
    %234 = vector.broadcast %233 : vector<8x1xf32> to vector<8x32xf32>
    %235 = arith.divf %230, %234 : vector<8x32xf32>
    %236 = vector.broadcast %5 : vector<1x32xf32> to vector<8x32xf32>
    %237 = arith.mulf %235, %236 : vector<8x32xf32>
    %238 = vector.broadcast %6 : vector<1x32xf32> to vector<8x32xf32>
    %239 = arith.addf %237, %238 : vector<8x32xf32>
    %240 = arith.truncf %239 : vector<8x32xf32> to vector<8x32xbf16>
    %c0_64 = arith.constant 0 : index
    %c0_65 = arith.constant 0 : index
    %241 = vector.load %arg5[%c0_64, %c0_65] : memref<32x64xbf16, #tpu.memory_space<vmem>>, vector<32x64xbf16>
    %cst_66 = arith.constant dense<0.000000e+00> : vector<8x64xf32>
    %242 = tpu.matmul %240, %241, %cst_66 {dimension_numbers = #tpu.dot_dimension_numbers<[1], [0], [0], [1], [0, 0, 1, 1], [], []>} : vector<8x32xbf16>, vector<32x64xbf16>, vector<8x64xf32> -> vector<8x64xf32>
    %c0_67 = arith.constant 0 : index
    %c0_68 = arith.constant 0 : index
    %243 = vector.load %arg6[%c0_67, %c0_68] : memref<1x64xf32, #tpu.memory_space<vmem>>, vector<1x64xf32>
    %244 = vector.broadcast %243 : vector<1x64xf32> to vector<8x64xf32>
    %245 = arith.addf %242, %244 : vector<8x64xf32>
    %cst_69 = arith.constant 0.000000e+00 : f32
    %246 = vector.broadcast %cst_69 : f32 to vector<8x64xf32>
    %247 = arith.maximumf %245, %246 : vector<8x64xf32>
    %248 = arith.truncf %247 : vector<8x64xf32> to vector<8x64xbf16>
    %c0_70 = arith.constant 0 : index
    %c0_71 = arith.constant 0 : index
    %249 = vector.load %arg7[%c0_70, %c0_71] : memref<64x32xbf16, #tpu.memory_space<vmem>>, vector<64x32xbf16>
    %cst_72 = arith.constant dense<0.000000e+00> : vector<8x32xf32>
    %250 = tpu.matmul %248, %249, %cst_72 {dimension_numbers = #tpu.dot_dimension_numbers<[1], [0], [0], [1], [0, 0, 1, 1], [], []>} : vector<8x64xbf16>, vector<64x32xbf16>, vector<8x32xf32> -> vector<8x32xf32>
    %251 = vector.broadcast %8 : vector<1x32xf32> to vector<8x32xf32>
    %252 = arith.addf %250, %251 : vector<8x32xf32>
    %253 = arith.addf %252, %217 : vector<8x32xf32>
    %254 = vector.shape_cast %253 : vector<8x32xf32> to vector<1x8x32xf32>
    %c0_73 = arith.constant 0 : index
    %c0_74 = arith.constant 0 : index
    %c0_75 = arith.constant 0 : index
    %255 = vector.load %arg9[%c0_73, %c0_74, %c0_75] : memref<1x8x32xf32, #tpu.memory_space<vmem>>, vector<1x8x32xf32>
    tpu.vector_store %arg9[%c0_73, %c0_74, %c0_75], %254 {strides = array<i32>} : memref<1x8x32xf32, #tpu.memory_space<vmem>>, vector<1x8x32xf32>,
    return
  }
  func.func @transform_0(%arg0: i32) -> (i32, i32, i32) {
    %c0_i32 = arith.constant 0 : i32
    %c0_i32_0 = arith.constant 0 : i32
    %c0_i32_1 = arith.constant 0 : i32
    return %arg0, %c0_i32, %c0_i32_0 : i32, i32, i32
  }
  func.func @transform_1(%arg0: i32) -> (i32, i32) {
    %c0_i32 = arith.constant 0 : i32
    %c0_i32_0 = arith.constant 0 : i32
    %c0_i32_1 = arith.constant 0 : i32
    return %c0_i32, %c0_i32_0 : i32, i32
  }
  func.func @transform_2(%arg0: i32) -> (i32, i32) {
    %c0_i32 = arith.constant 0 : i32
    %c0_i32_0 = arith.constant 0 : i32
    %c0_i32_1 = arith.constant 0 : i32
    return %c0_i32, %c0_i32_0 : i32, i32
  }
  func.func @transform_3(%arg0: i32) -> (i32, i32) {
    %c0_i32 = arith.constant 0 : i32
    %c0_i32_0 = arith.constant 0 : i32
    %c0_i32_1 = arith.constant 0 : i32
    return %c0_i32, %c0_i32_0 : i32, i32
  }
  func.func @transform_4(%arg0: i32) -> (i32, i32) {
    %c0_i32 = arith.constant 0 : i32
    %c0_i32_0 = arith.constant 0 : i32
    %c0_i32_1 = arith.constant 0 : i32
    return %c0_i32, %c0_i32_0 : i32, i32
  }
  func.func @transform_5(%arg0: i32) -> (i32, i32) {
    %c0_i32 = arith.constant 0 : i32
    %c0_i32_0 = arith.constant 0 : i32
    %c0_i32_1 = arith.constant 0 : i32
    return %c0_i32, %c0_i32_0 : i32, i32
  }
  func.func @transform_6(%arg0: i32) -> (i32, i32) {
    %c0_i32 = arith.constant 0 : i32
    %c0_i32_0 = arith.constant 0 : i32
    %c0_i32_1 = arith.constant 0 : i32
    return %c0_i32, %c0_i32_0 : i32, i32
  }
  func.func @transform_7(%arg0: i32) -> (i32, i32) {
    %c0_i32 = arith.constant 0 : i32
    %c0_i32_0 = arith.constant 0 : i32
    %c0_i32_1 = arith.constant 0 : i32
    return %c0_i32, %c0_i32_0 : i32, i32
  }
  func.func @transform_8(%arg0: i32) -> (i32, i32, i32) {
    %c0_i32 = arith.constant 0 : i32
    %c0_i32_0 = arith.constant 0 : i32
    %c0_i32_1 = arith.constant 0 : i32
    return %arg0, %c0_i32, %c0_i32_0 : i32, i32, i32
  }
}

</mosaic_0001>

<bundles_post_ra>
// kernel: tpu_custom_call.1
= control target key start
LH: loop header
LB: loop body
LE: loop exit
PB: predicated region body
PF: predicated region fallthrough
CT: control target
= control target key end

     0   :  { %13 = vsyncpa [#allocation4], 0  ;;  %s2600_s0 = inlined_call_operand.vmem [shape: f32[2,8,32], index: 0, kind: input, shape index: {}]   ;;  %s2601_s1 = inlined_call_operand.vmem [shape: bf16[32,96], index: 1, kind: input, shape index: {}]   ;;  %s2602_s2 = inlined_call_operand.vmem [shape: f32[1,96], index: 2, kind: input, shape index: {}]   ;;  %s2603_s3 = inlined_call_operand.vmem [shape: bf16[32,32], index: 3, kind: input, shape index: {}]   ;;  %s2604_s4 = inlined_call_operand.hbm [shape: bf16[32,64], index: 4, kind: input, shape index: {}]   ;;  %s2605_s5 = inlined_call_operand.vmem [shape: f32[1,64], index: 5, kind: input, shape index: {}]   ;;  %s2606_s6 = inlined_call_operand.vmem [shape: bf16[64,32], index: 6, kind: input, shape index: {}]   ;;  %s2607_s7 = inlined_call_operand.vmem [shape: f32[6,32], index: 7, kind: input, shape index: {}]   ;;  %s2608_s8 = inlined_call_operand.hbm [shape: f32[2,8,32], index: 8, kind: output, shape index: {}]  }
   0x1   :  { %14 = vsyncpa [#allocation5], 0 }
   0x2   :  { %16 = vsyncpa [#allocation5 + $0x1], 0  ;;  %s2209_s27 = smov 0   ;;  %s2211_s28 = smov 0  }
   0x3   :  { %s2213_s29 = smov 0   ;;  %s2215_s30 = smov 0  }
   0x4 LB: > { %s2230_s9 = sadd.s32 4294967295, %s2126_s30   ;;  %s1676_s10 = sadd.s32 4294967294, %s2126_s30   ;;  %s2126_s30 = sphi %s2215_s30, %s2624_s30   ;;  %s2122_s29 = sphi %s2213_s29, %s2623_s29   ;;  %s2118_s28 = sphi %s2211_s28, %s2622_s28   ;;  %s2114_s27 = sphi %s2209_s27, %s2621_s27  }
   0x5   : > { %s2234_s11 = sadd.s32 1, %s2126_s30   ;;  %s202_s12 = sadd.s32 1, %s2122_s29 }
   0x6   : > { %s199_s13 = ssub.s32 %s2126_s30, %s2234_s11  ;;  %p212_p0 = scmp.ne.s32.totalorder %s2122_s29, %s2118_s28 }
   0x7   : > { %p200_p1 = scmp.eq.s32.totalorder %s199_s13, 0  ;;  %p213_p2 = scmp.eq.s32.totalorder %s2230_s9, 1 }
   0x8   : > { %p218_p3 = scmp.ne.s32.totalorder %s2118_s28, %s2114_s27  ;;  %p219_p4 = scmp.eq.s32.totalorder %s1676_s10, 1 }
   0x9   : > { %s2245_s14 = scalar_select %p200_p1, %s2122_s29, %s202_s12  }
   0xa   : > { %p2247_p5 = por %p213_p2, %p212_p0  ;;  %p2251_p6 = por %p219_p4, %p218_p3 }
   0xb   : > { %p1677_p7 = scmp.ge.s32.totalorder %s2126_s30, 1  ;;  %p226_p8 = scmp.lt.s32.totalorder %s2126_s30, 3 }
   0xc   : > { %s2612_s15 = scalar_select %p2247_p5, 1, 0 }
   0xd   : > { %s2613_s16 = scalar_select %p2251_p6, 1, 0 }
   0xe   : > { %p2609_p9 = scmp.eq.s32.totalorder %s2230_s9, 0  ;;  %p2258_p10 = pnand %p1677_p7, %p226_p8 }
   0xf   : > { %s2128_s18 = smov [#allocation3]   ;;  %s2032_s23 = scalar_lea.hbm %s2604_s4, 256 }
  0x10   : > { %s2614_s17 = scalar_select %p2258_p10, 1, 0 }
  0x11   : > { %s247_s19 = sshll.u32 %s2128_s18, 4  ;;  %p1904_p11 = pneg %p2258_p10  ;;  %s248_s19 = int_to_ptr.vmem [resolvable:$true] %s247_s19 }
  0x12   : > { %p2033_p13 = scmp.ne.s32.totalorder %s2604_s4, %s2032_s23  ;;  %p2039_p3 = scmp.lt.u32.totalorder %s2032_s23, %s2604_s4 }
  0x13   : > { %p2266_p12 = pnand %p2609_p9, %p1904_p11 }
  0x15   : > { %p2034_p0 = pneg %p2266_p12 }
  0x17   : > { %p2035_p1 = pnand %p2034_p0, %p2033_p13 }
  0x19   : > { %p2036_p2 = pneg %p2035_p1 }
  0x1b   : > { %p2041_p4 = pnand %p2039_p3, %p2036_p2 }
  0x1d   : > { %2044 = shalt.err (!%p2041_p4)
}
  0x1e   : > { %s2045_s12 = scalar_lea.vmem %s248_s19, 256  ;;  %p2053_p9 = scmp.lt.s32.totalorder %s248_s19, %s248_s19 }
  0x1f   : > { %p2046_p7 = scmp.ne.s32.totalorder %s248_s19, %s2045_s12  ;;  %p2054_p6 = scmp.lt.s32.totalorder %s2045_s12, %s2045_s12 }
  0x21   : > { %p2048_p8 = pnand %p2046_p7, %p2034_p0  ;;  %p2055_p5 = por %p2054_p6, %p2053_p9 }
  0x23   : > { %p2049_p11 = pneg %p2048_p8 }
  0x25   : > { %p2056_p10 = pnand %p2055_p5, %p2049_p11 }
  0x27   : > { %2059 = shalt.err (!%p2056_p10)
}
  0x28   : > { %s2129_s13 = smov 64   ;;  %s2130_s18 = smov 4  }
  0x29   : > { %1907 = dma.hbm_to_vmem [thread:$0]  (!%p2266_p12), %s2604_s4, 256, %s248_s19, [#allocation4], %s2129_s13, %s2129_s13, %s2130_s18  }
  0x2a   : > { %p2616_p13 = scmp.ne.s32.totalorder %s2614_s17, 0 }
  0x2b   : > { %p2617_p1 = scmp.eq.s32.totalorder (!%p2616_p13), %s2230_s9, 0 }
  0x2c   : > { %279 = sbr.rel (%p2616_p13) target bundleno = 2697 (0xa89), region = 52 }
  0x33   : > { %2105 = dma.done.wait (%p2617_p1), [#allocation4], 256   ;;  %p2618_p0 = pmov %p2617_p1 }
  0x34   : > { %p312_p5 = scmp.lt.s32.totalorder %s2230_s9, 1  ;;  %vm319_vm0 = vcmask 261120   ;;  %v1982_v7 = vld [vmem:[%s2601_s1] sm:$0xff]   ;;  %v2131_v8 = vmov 0.0   ;;  %vm2132_vm1 = vmmov 0   ;;  %v1983_v9 = vld [vmem:[%s2601_s1 + $0x8] sm:$0xff]   ;;  %v341_v17 = vlaneseq }
  0x35   : > { %2107 = vsyncadd (%p2618_p0), [#allocation4], 4294967040  ;;  %1766 = vmatprep.subr.bf16.mxu0 %v2131_v8  ;;  %1770 = vmatprep.mubr.msk.bf16.mxu0 %vm2132_vm1, %v2131_v8  ;;  %v2323_v21 = vld [vmem:[%s2607_s7] sm:$0x3f]  ;;  %s2135_s25 = smov 76   ;;  %s2136_s20 = smov 92  }
  0x36   : > { %s313_s23 = scalar_select %p312_p5, %s2230_s9, 1  ;;  %1767 = vmatpush3.bf16.msra.mxu0 %v1982_v7  ;;  %1774 = vmatprep.subr.bf16.mxu1 %v2131_v8  ;;  %v2317_v19 = vshrl.u32 %v341_v17, 7  ;;  %v1684_v30 = vld [vmem:[%s2602_s2] ss:$0 sm:$0xff]  ;;  %vm422_vm4 = vcmask 31744   ;;  %vm469_vm5 = vcmask 64512  }
  0x37   : > { %1768 = vmatprep.subr.bf16.mxu0 %v2131_v8  ;;  %1776 = vmatprep.mubr.msk.bf16.mxu1 %vm2132_vm1, %v2131_v8  ;;  %s2138_s17 = smov 88   ;;  %s2139_s19 = smov 68   ;;  %vm487_vm6 = vcmask 1043456   ;;  %vm646_vm7 = vcmask 64544   ;;  %vm762_vm8 = vcmask 97344   ;;  %vm878_vm9 = vcmask 130144  }
  0x38   : > { %s1683_s24 = sshll.u32 %s313_s23, 3  ;;  %v343_v20 = vsub.s32 0, %v2317_v19  ;;  %v348_v22 = vsub.s32 1, %v2317_v19  ;;  %s2133_s23 = smov 124   ;;  %vm994_vm10 = vcmask 162944   ;;  %vm1110_vm11 = vcmask 195744  }
  0x39   : > { %s315_s26 = scalar_lea.vmem %s2600_s0, %s1683_s24  ;;  %s2134_s24 = smov 96   ;;  %vm1226_vm12 = vcmask 228544   ;;  %vm1342_vm13 = vcmask 261344  }
  0x3a   : > { %v2297_v0 = vld [vmem:[%s315_s26] sm:$0xff]  ;;  %1769 = vmatpush3.bf16.msra.mxu0 %v1983_v9  ;;  %v344_v23 = vrot.slane %v2323_v21, %v343_v20  ;;  %v349_v26 = vrot.slane %v2323_v21, %v348_v22  ;;  %s2137_s26 = smov 72   ;;  %s2140_s10 = smov 120  }
  0x3b   : > { %v320_v1 = vsel %vm319_vm0, %v2297_v0, 0.0  ;;  %1780 = vmatprep.subr.bf16.mxu0 %v2131_v8  ;;  %s2141_s12 = smov 84   ;;  %s2142_s13 = smov 116  }
  0x3c   : > { %321 = vadd.xlane.f32.xlu0 %v320_v1  ;;  %s2143_s18 = smov 80   ;;  %s2144_s21 = smov 112  }
  0x3d   : > { %s2145_s22 = smov 108   ;;  %p2619_p9 = scmp.ne.s32.totalorder %s2612_s15, 0 }
  0xc9   : > { %v322_v2 = vpop.xlane.xlu0 %321 }
  0xca   : > { %v324_v3 = vmul.f32 0.03125, %v322_v2 }
  0xcc   : > { %v325_v4 = vsub.f32 %v2297_v0, %v324_v3 }
  0xce   : > { %v326_v5 = vmul.f32 %v325_v4, %v325_v4 }
  0xd0   : > { %v327_v6 = vsel %vm319_vm0, %v326_v5, 0.0 }
  0xd1   : > { %328 = vadd.xlane.f32.xlu0 %v327_v6 }
 0x15e   : > { %v329_v10 = vpop.xlane.xlu0 %328 }
 0x15f   : > { %v330_v11 = vmul.f32 0.032258064, %v329_v10 }
 0x161   : > { %1992 = vrsqrt.f32 %v330_v11  ;;  %vm333_vm2 = vcmp.eq.f32.partialorder %v330_v11, inf  ;;  %v336_v14 = vand.u32 2147483648, %v330_v11  ;;  %vm335_vm3 = vcmp.eq.f32.partialorder %v330_v11, 0.0 }
 0x16b   : > { %v1993_v12 = vpop.eup %1992 }
 0x16c   : > { %v332_v13 = vmul.f32 %v1993_v12, %v330_v11 }
 0x16e   : > { %v334_v15 = vsel %vm333_vm2, %v330_v11, %v332_v13 }
 0x16f   : > { %v337_v16 = vsel %vm335_vm3, %v336_v14, %v334_v15 }
 0x170   : > { %v338_v18 = vadd.f32 1e-06, %v337_v16 }
 0x172   : > { %1994 = vrcp.f32 %v338_v18 }
 0x17c   : > { %v1995_v24 = vpop.eup %1994 }
 0x17d   : > { %v340_v25 = vmul.f32 %v1995_v24, %v325_v4 }
 0x17f   : > { %v345_v27 = vmul.f32 %v344_v23, %v340_v25 }
 0x181   : > { %v350_v28 = vadd.f32 %v349_v26, %v345_v27 }
 0x183   : > { %v351_v29 = vpack.c.bf16 %v350_v28, %v350_v28 }
 0x185   : > { %1771 = vmatmul.mubr.msk.bf16.vlgmr.msra.gmra.mrb[0].mxu0 %vm319_vm0, %v351_v29 }
 0x186   : > { %1782 = vmatprep.mubr.msk.bf16.mxu0 %vm2132_vm1, %v2131_v8 }
 0x258   : > { %v412_v31 = vpop.f32.mrb[0].mxu0 }
 0x259   : > { %v413_v32 = vadd.f32 %v1684_v30, %v412_v31  ;;  %v1772_v33 = vpop.f32.mrb[1].mxu0 }
 0x25a   : > { %v415_v34 = vpop.f32.mrb[2].mxu0 }
 0x25b   : > { %v2334_v35 = vpack.c.bf16 %v413_v32, %v413_v32  ;;  %v1773_v36 = vpop.f32.mrb[3].mxu0 }
 0x25d   : > { %532 = vrot.lane.b32.xlu0 %v2334_v35, %s2133_s23  ;;  %420 = vrot.lane.b32.xlu1 %v2334_v35, %s2134_s24  ;;  %s2146_s23 = smov 104   ;;  %s2147_s24 = smov 100  }
 0x261   : > { %998 = vrot.lane.b32.xlu0 %v2334_v35, %s2135_s25  ;;  %534 = vrot.lane.b32.xlu1 %v2334_v35, %s2136_s20  ;;  %s2148_s25 = smov 60   ;;  %s2149_s20 = smov 64  }
 0x265   : > { %1114 = vrot.lane.b32.xlu0 %v2334_v35, %s2137_s26  ;;  %650 = vrot.lane.b32.xlu1 %v2334_v35, %s2138_s17  ;;  %s2150_s26 = smov 56   ;;  %s2151_s17 = smov 52  }
 0x269   : > { %1230 = vrot.lane.b32.xlu0 %v2334_v35, %s2139_s19  ;;  %648 = vrot.lane.b32.xlu1 %v2334_v35, %s2140_s10  ;;  %s2152_s19 = smov 44   ;;  %s2153_s10 = smov 40  }
 0x26d   : > { %766 = vrot.lane.b32.xlu1 %v2334_v35, %s2141_s12  ;;  %s2154_s12 = smov 36  }
 0x271   : > { %764 = vrot.lane.b32.xlu1 %v2334_v35, %s2142_s13  ;;  %s2155_s13 = smov 48  }
 0x275   : > { %882 = vrot.lane.b32.xlu1 %v2334_v35, %s2143_s18  ;;  %s2156_s18 = smov 4  }
 0x279   : > { %880 = vrot.lane.b32.xlu1 %v2334_v35, %s2144_s21  ;;  %s2157_s21 = smov 8  }
 0x27d   : > { %996 = vrot.lane.b32.xlu1 %v2334_v35, %s2145_s22  ;;  %s2158_s22 = smov 12  }
 0x281   : > { %1112 = vrot.lane.b32.xlu1 %v2334_v35, %s2146_s23  ;;  %s2159_s23 = smov 16  }
 0x285   : > { %1228 = vrot.lane.b32.xlu1 %v2334_v35, %s2147_s24  ;;  %s2160_s24 = smov 20  }
 0x2cf   : > { %v421_v37 = vpop.permute.xlu1 %420  ;;  %v533_v43 = vpop.permute.xlu0 %532 }
 0x2d0   : > { %v427_v38 = vsel %vm422_vm4, %v421_v37, 0 }
 0x2d1   : > { %1775 = vmatpush3.bf16.xpose.msra.mxu1 %v427_v38 }
 0x2d2   : > { %1786 = vmatprep.subr.bf16.mxu1 %v2131_v8 }
 0x2d3   : > { %v535_v39 = vpop.permute.xlu1 %534  ;;  %v999_v50 = vpop.permute.xlu0 %998 }
 0x2d4   : > { %v540_v41 = vsel %vm422_vm4, %v535_v39, 0  ;;  %v1004_v52 = vsel %vm422_vm4, %v999_v50, 0 }
 0x2d7   : > { %v651_v40 = vpop.permute.xlu1 %650  ;;  %v1115_v53 = vpop.permute.xlu0 %1114 }
 0x2d8   : > { %1777 = vmatmul.mubr.msk.bf16.vlgmr.msra.gmra.mrb[0].mxu1 %vm422_vm4, %v2334_v35  ;;  %v656_v44 = vsel %vm422_vm4, %v651_v40, 0  ;;  %v1120_v55 = vsel %vm422_vm4, %v1115_v53, 0 }
 0x2d9   : > { %1787 = vmatpush3.bf16.xpose.msra.mxu1 %v540_v41  ;;  %1788 = vmatprep.mubr.msk.bf16.mxu1 %vm2132_vm1, %v2131_v8 }
 0x2da   : > { %1798 = vmatprep.subr.bf16.mxu1 %v2131_v8 }
 0x2db   : > { %v649_v42 = vpop.permute.xlu1 %648  ;;  %v1231_v56 = vpop.permute.xlu0 %1230 }
 0x2dc   : > { %v1236_v58 = vsel %vm422_vm4, %v1231_v56, 0 }
 0x2df   : > { %v767_v45 = vpop.permute.xlu1 %766 }
 0x2e0   : > { %1789 = vmatmul.mubr.msk.bf16.vlgmr.msra.gmra.mrb[4].mxu1 %vm422_vm4, %v533_v43  ;;  %v772_v47 = vsel %vm422_vm4, %v767_v45, 0 }
 0x2e1   : > { %1799 = vmatpush3.bf16.xpose.msra.mxu1 %v656_v44  ;;  %1800 = vmatprep.mubr.msk.bf16.mxu1 %vm2132_vm1, %v2131_v8 }
 0x2e2   : > { %1810 = vmatprep.subr.bf16.mxu1 %v2131_v8 }
 0x2e3   : > { %v765_v46 = vpop.permute.xlu1 %764 }
 0x2e7   : > { %v883_v48 = vpop.permute.xlu1 %882 }
 0x2e8   : > { %1801 = vmatmul.mubr.msk.bf16.vlgmr.msra.gmra.mrb[8].mxu1 %vm422_vm4, %v649_v42  ;;  %v888_v49 = vsel %vm422_vm4, %v883_v48, 0 }
 0x2e9   : > { %1811 = vmatpush3.bf16.xpose.msra.mxu1 %v772_v47  ;;  %1812 = vmatprep.mubr.msk.bf16.mxu1 %vm2132_vm1, %v2131_v8 }
 0x2ea   : > { %1822 = vmatprep.subr.bf16.mxu1 %v2131_v8 }
 0x2eb   : > { %v881_v51 = vpop.permute.xlu1 %880 }
 0x2ef   : > { %v997_v54 = vpop.permute.xlu1 %996 }
 0x2f0   : > { %1813 = vmatmul.mubr.msk.bf16.vlgmr.msra.gmra.mrb[12].mxu1 %vm422_vm4, %v765_v46 }
 0x2f1   : > { %1823 = vmatpush3.bf16.xpose.msra.mxu1 %v888_v49  ;;  %1824 = vmatprep.mubr.msk.bf16.mxu1 %vm2132_vm1, %v2131_v8 }
 0x2f2   : > { %1834 = vmatprep.subr.bf16.mxu1 %v2131_v8 }
 0x2f3   : > { %v1113_v57 = vpop.permute.xlu1 %1112 }
 0x2f7   : > { %v1229_v59 = vpop.permute.xlu1 %1228 }
 0x2f8   : > { %1825 = vmatmul.mubr.msk.bf16.vlgmr.msra.gmra.mrb[16].mxu1 %vm422_vm4, %v881_v51 }
 0x2f9   : > { %1835 = vmatpush3.bf16.xpose.msra.mxu1 %v1004_v52  ;;  %1836 = vmatprep.mubr.msk.bf16.mxu1 %vm2132_vm1, %v2131_v8 }
 0x2fa   : > { %1846 = vmatprep.subr.bf16.mxu1 %v2131_v8 }
 0x300   : > { %1837 = vmatmul.mubr.msk.bf16.vlgmr.msra.gmra.mrb[20].mxu1 %vm422_vm4, %v997_v54 }
 0x301   : > { %1847 = vmatpush3.bf16.xpose.msra.mxu1 %v1120_v55  ;;  %1848 = vmatprep.mubr.msk.bf16.mxu1 %vm2132_vm1, %v2131_v8 }
 0x302   : > { %1858 = vmatprep.subr.bf16.mxu1 %v2131_v8 }
 0x308   : > { %1849 = vmatmul.mubr.msk.bf16.vlgmr.msra.gmra.mrb[24].mxu1 %vm422_vm4, %v1113_v57 }
 0x309   : > { %1859 = vmatpush3.bf16.xpose.msra.mxu1 %v1236_v58  ;;  %1860 = vmatprep.mubr.msk.bf16.mxu1 %vm2132_vm1, %v2131_v8 }
 0x30a   : > { %1870 = vmatprep.subr.bf16.mxu1 %v2131_v8 }
 0x310   : > { %1861 = vmatmul.mubr.msk.bf16.vlgmr.msra.gmra.mrb[28].mxu1 %vm422_vm4, %v1229_v59 }
 0x311   : > { %1874 = vmatprep.mubr.msk.bf16.mxu1 %vm2132_vm1, %v2131_v8 }
 0x3ab   : > { %v463_v60 = vpop.f32.mrb[0].mxu1 }
 0x3ac   : > { %v1778_v61 = vpop.f32.mrb[1].mxu1  ;;  %v470_v62 = vsel %vm469_vm5, %v463_v60, -inf }
 0x3ad   : > { %471 = vmax.xlane.f32.xlu0 %v470_v62  ;;  %v466_v63 = vpop.f32.mrb[2].mxu1 }
 0x3ae   : > { %v1779_v1 = vpop.f32.mrb[3].mxu1 }
 0x3b3   : > { %v576_v2 = vpop.f32.mrb[4].mxu1 }
 0x3b4   : > { %v1790_v3 = vpop.f32.mrb[5].mxu1  ;;  %v582_v4 = vsel %vm469_vm5, %v576_v2, -inf }
 0x3b5   : > { %583 = vmax.xlane.f32.xlu1 %v582_v4  ;;  %v579_v5 = vpop.f32.mrb[6].mxu1 }
 0x3b6   : > { %v1791_v6 = vpop.f32.mrb[7].mxu1 }
 0x3bb   : > { %v692_v7 = vpop.f32.mrb[8].mxu1 }
 0x3bc   : > { %v1802_v9 = vpop.f32.mrb[9].mxu1  ;;  %v698_v10 = vsel %vm469_vm5, %v692_v7, -inf }
 0x3bd   : > { %699 = vmax.xlane.f32.xlu0 %v698_v10  ;;  %v695_v11 = vpop.f32.mrb[10].mxu1 }
 0x3be   : > { %v1803_v12 = vpop.f32.mrb[11].mxu1 }
 0x3c3   : > { %v2395_v13 = vpop.f32.mrb[12].mxu1 }
 0x3c4   : > { %v1814_v14 = vpop.f32.mrb[13].mxu1  ;;  %v814_v15 = vsel %vm469_vm5, %v2395_v13, -inf }
 0x3c5   : > { %815 = vmax.xlane.f32.xlu0 %v814_v15  ;;  %v811_v16 = vpop.f32.mrb[14].mxu1 }
 0x3c6   : > { %v1815_v17 = vpop.f32.mrb[15].mxu1 }
 0x3cb   : > { %v2399_v18 = vpop.f32.mrb[16].mxu1 }
 0x3cc   : > { %v1826_v20 = vpop.f32.mrb[17].mxu1  ;;  %v930_v22 = vsel %vm469_vm5, %v2399_v18, -inf }
 0x3cd   : > { %931 = vmax.xlane.f32.xlu1 %v930_v22  ;;  %v927_v23 = vpop.f32.mrb[18].mxu1 }
 0x3ce   : > { %v1827_v24 = vpop.f32.mrb[19].mxu1 }
 0x3d3   : > { %v2403_v25 = vpop.f32.mrb[20].mxu1 }
 0x3d4   : > { %v1838_v26 = vpop.f32.mrb[21].mxu1  ;;  %v1046_v27 = vsel %vm469_vm5, %v2403_v25, -inf }
 0x3d5   : > { %1047 = vmax.xlane.f32.xlu0 %v1046_v27  ;;  %v1043_v28 = vpop.f32.mrb[22].mxu1 }
 0x3d6   : > { %v1839_v29 = vpop.f32.mrb[23].mxu1 }
 0x3db   : > { %v1156_v30 = vpop.f32.mrb[24].mxu1 }
 0x3dc   : > { %v1850_v31 = vpop.f32.mrb[25].mxu1  ;;  %v1162_v32 = vsel %vm469_vm5, %v1156_v30, -inf }
 0x3dd   : > { %1163 = vmax.xlane.f32.xlu1 %v1162_v32  ;;  %v1159_v33 = vpop.f32.mrb[26].mxu1 }
 0x3de   : > { %v1851_v34 = vpop.f32.mrb[27].mxu1 }
 0x3e3   : > { %v2408_v36 = vpop.f32.mrb[28].mxu1 }
 0x3e4   : > { %v1862_v37 = vpop.f32.mrb[29].mxu1  ;;  %v1278_v40 = vsel %vm469_vm5, %v2408_v36, -inf }
 0x3e5   : > { %v1275_v38 = vpop.f32.mrb[30].mxu1 }
 0x3e6   : > { %v1863_v39 = vpop.f32.mrb[31].mxu1 }
 0x3eb   : > { %594 = vrot.lane.b32.xlu0 %v2334_v35, %s2148_s25 }
 0x3ee   : > { %482 = vrot.lane.b32.xlu1 %v2334_v35, %s2149_s20 }
 0x40a   : > { %1279 = vmax.xlane.f32.xlu0 %v1278_v40 }
 0x43a   : > { %v472_v41 = vpop.xlane.xlu0 %471 }
 0x43b   : > { %v473_v42 = vsub.f32 %v463_v60, %v472_v41 }
 0x43d   : > { %v474_v43 = vmul.f32 1.442695, %v473_v42 }
 0x43f   : > { %1996 = vpow2.f32 %v474_v43 }
 0x442   : > { %v584_v44 = vpop.xlane.xlu1 %583 }
 0x443   : > { %v585_v45 = vsub.f32 %v576_v2, %v584_v44 }
 0x445   : > { %v586_v46 = vmul.f32 1.442695, %v585_v45 }
 0x447   : > { %1998 = vpow2.f32 %v586_v46 }
 0x449   : > { %v2414_v47 = vpop.eup %1996 }
 0x44a   : > { %v700_v48 = vpop.xlane.xlu0 %699  ;;  %v476_v49 = vsel %vm469_vm5, %v2414_v47, 0.0 }
 0x44b   : > { %v701_v50 = vsub.f32 %v692_v7, %v700_v48  ;;  %477 = vadd.xlane.f32.xlu1 %v476_v49 }
 0x44d   : > { %v702_v51 = vmul.f32 1.442695, %v701_v50 }
 0x44f   : > { %2000 = vpow2.f32 %v702_v51 }
 0x451   : > { %v2418_v52 = vpop.eup %1998 }
 0x452   : > { %v588_v53 = vsel %vm469_vm5, %v2418_v52, 0.0  ;;  %v816_v59 = vpop.xlane.xlu0 %815 }
 0x453   : > { %589 = vadd.xlane.f32.xlu0 %v588_v53  ;;  %v817_v61 = vsub.f32 %v2395_v13, %v816_v59 }
 0x455   : > { %v818_v62 = vmul.f32 1.442695, %v817_v61 }
 0x457   : > { %2002 = vpow2.f32 %v818_v62 }
 0x459   : > { %v2422_v54 = vpop.eup %2000 }
 0x45a   : > { %v704_v55 = vsel %vm469_vm5, %v2422_v54, 0.0  ;;  %v932_v56 = vpop.xlane.xlu1 %931 }
 0x45b   : > { %705 = vadd.xlane.f32.xlu1 %v704_v55  ;;  %v933_v63 = vsub.f32 %v2399_v18, %v932_v56 }
 0x45d   : > { %v934_v3 = vmul.f32 1.442695, %v933_v63 }
 0x45f   : > { %2004 = vpow2.f32 %v934_v3 }
 0x461   : > { %v2433_v7 = vpop.eup %2002 }
 0x462   : > { %v1048_v1 = vpop.xlane.xlu0 %1047  ;;  %v820_v9 = vsel %vm469_vm5, %v2433_v7, 0.0 }
 0x463   : > { %v1049_v2 = vsub.f32 %v2403_v25, %v1048_v1 }
 0x465   : > { %v1050_v5 = vmul.f32 1.442695, %v1049_v2 }
 0x466   : > { %v595_v16 = vpop.permute.xlu0 %594 }
 0x467   : > { %2006 = vpow2.f32 %v1050_v5  ;;  %v600_v29 = vsel %vm487_vm6, %v595_v16, 0 }
 0x469   : > { %710 = vrot.lane.b32.xlu0 %v2334_v35, %s2150_s26  ;;  %v2437_v10 = vpop.eup %2004 }
 0x46a   : > { %v1164_v57 = vpop.xlane.xlu1 %1163  ;;  %v936_v12 = vsel %vm469_vm5, %v2437_v10, 0.0 }
 0x46b   : > { %v1165_v4 = vsub.f32 %v1156_v30, %v1164_v57 }
 0x46c   : > { %826 = vrot.lane.b32.xlu1 %v2334_v35, %s2151_s17  ;;  %s309_s17 = sand.u32 1, %s2118_s28  }
 0x46d   : > { %v1166_v6 = vmul.f32 1.442695, %v1165_v4 }
 0x46e   : > { %v483_v58 = vpop.permute.xlu1 %482 }
 0x46f   : > { %v489_v60 = vsel %vm487_vm6, %v483_v58, 0  ;;  %2008 = vpow2.f32 %v1166_v6 }
 0x470   : > { %1781 = vmatpush3.bf16.msra.mxu0 %v489_v60 }
 0x471   : > { %1792 = vmatprep.subr.bf16.mxu0 %v2131_v8  ;;  %v2439_v11 = vpop.eup %2006 }
 0x472   : > { %v1052_v14 = vsel %vm469_vm5, %v2439_v11, 0.0 }
 0x479   : > { %v2443_v13 = vpop.eup %2008 }
 0x47a   : > { %v1168_v15 = vsel %vm469_vm5, %v2443_v13, 0.0 }
 0x488   : > { %821 = vadd.xlane.f32.xlu0 %v820_v9 }
 0x48c   : > { %937 = vadd.xlane.f32.xlu0 %v936_v12 }
 0x490   : > { %1053 = vadd.xlane.f32.xlu1 %v1052_v14  ;;  %1169 = vadd.xlane.f32.xlu0 %v1168_v15 }
 0x497   : > { %v1280_v17 = vpop.xlane.xlu0 %1279 }
 0x498   : > { %v1281_v18 = vsub.f32 %v2408_v36, %v1280_v17 }
 0x49a   : > { %v1282_v20 = vmul.f32 1.442695, %v1281_v18 }
 0x49c   : > { %2010 = vpow2.f32 %v1282_v20 }
 0x4a1   : > { %1058 = vrot.lane.b32.xlu1 %v2334_v35, %s2152_s19  ;;  %s2161_s19 = smov 24  }
 0x4a5   : > { %1174 = vrot.lane.b32.xlu1 %v2334_v35, %s2153_s10  ;;  %s2162_s10 = smov 28  }
 0x4a6   : > { %v2452_v22 = vpop.eup %2010 }
 0x4a7   : > { %v1284_v23 = vsel %vm469_vm5, %v2452_v22, 0.0 }
 0x4a8   : > { %1285 = vadd.xlane.f32.xlu0 %v1284_v23 }
 0x4a9   : > { %1290 = vrot.lane.b32.xlu1 %v2334_v35, %s2154_s12 }
 0x4be   : > { %942 = vrot.lane.b32.xlu0 %v2334_v35, %s2155_s13 }
 0x4d8   : > { %v478_v24 = vpop.xlane.xlu1 %477 }
 0x4d9   : > { %2012 = vrcp.f32 %v478_v24 }
 0x4e0   : > { %v590_v25 = vpop.xlane.xlu0 %589 }
 0x4e1   : > { %2014 = vrcp.f32 %v590_v25 }
 0x4e3   : > { %v2013_v26 = vpop.eup %2012 }
 0x4e4   : > { %v480_v27 = vmul.f32 %v2013_v26, %v2414_v47  ;;  %v711_v32 = vpop.permute.xlu0 %710 }
 0x4e5   : > { %v716_v34 = vsel %vm487_vm6, %v711_v32, 0  ;;  %v1984_v32 = vld [vmem:[%s2603_s3] sm:$0xff]  }
 0x4e6   : > { %v481_v28 = vpack.c.bf16 %v480_v27, %v480_v27  ;;  %1871 = vmatpush3.bf16.msra.mxu1 %v1984_v32 }
 0x4e7   : > { %1872 = vmatprep.subr.bf16.mxu1 %v2131_v8 }
 0x4e8   : > { %1783 = vmatmul.mubr.msk.bf16.vlgmr.msra.gmra.mrb[4].mxu0 %vm469_vm5, %v481_v28  ;;  %v706_v30 = vpop.xlane.xlu1 %705 }
 0x4e9   : > { %1793 = vmatpush3.bf16.msra.mxu0 %v600_v29  ;;  %2016 = vrcp.f32 %v706_v30  ;;  %1794 = vmatprep.mubr.msk.bf16.mxu0 %vm2132_vm1, %v2131_v8 }
 0x4ea   : > { %1804 = vmatprep.subr.bf16.mxu0 %v2131_v8 }
 0x4eb   : > { %v2015_v35 = vpop.eup %2014 }
 0x4ec   : > { %v592_v31 = vmul.f32 %v2015_v35, %v2418_v52  ;;  %v827_v38 = vpop.permute.xlu1 %826 }
 0x4ed   : > { %v832_v40 = vsel %vm487_vm6, %v827_v38, 0 }
 0x4ee   : > { %v593_v33 = vpack.c.bf16 %v592_v31, %v592_v31 }
 0x4f0   : > { %1795 = vmatmul.mubr.msk.bf16.vlgmr.msra.gmra.mrb[8].mxu0 %vm469_vm5, %v593_v33  ;;  %v1985_v33 = vld [vmem:[%s2603_s3 + $0x8] sm:$0xff]  }
 0x4f1   : > { %1805 = vmatpush3.bf16.msra.mxu0 %v716_v34  ;;  %1806 = vmatprep.mubr.msk.bf16.mxu0 %vm2132_vm1, %v2131_v8 }
 0x4f2   : > { %1816 = vmatprep.subr.bf16.mxu0 %v2131_v8  ;;  %1873 = vmatpush3.bf16.msra.mxu1 %v1985_v33 }
 0x4f3   : > { %v2017_v36 = vpop.eup %2016  ;;  %1886 = vmatprep.subr.bf16.mxu1 %v2131_v8 }
 0x4f4   : > { %v708_v37 = vmul.f32 %v2017_v36, %v2422_v54 }
 0x4f6   : > { %v709_v39 = vpack.c.bf16 %v708_v37, %v708_v37 }
 0x4f8   : > { %1807 = vmatmul.mubr.msk.bf16.vlgmr.msra.gmra.mrb[12].mxu0 %vm469_vm5, %v709_v39 }
 0x4f9   : > { %1817 = vmatpush3.bf16.msra.mxu0 %v832_v40  ;;  %1818 = vmatprep.mubr.msk.bf16.mxu0 %vm2132_vm1, %v2131_v8 }
 0x4fa   : > { %1828 = vmatprep.subr.bf16.mxu0 %v2131_v8 }
 0x515   : > { %v822_v41 = vpop.xlane.xlu0 %821 }
 0x516   : > { %2018 = vrcp.f32 %v822_v41 }
 0x519   : > { %v938_v45 = vpop.xlane.xlu0 %937 }
 0x51a   : > { %2020 = vrcp.f32 %v938_v45 }
 0x51d   : > { %v1054_v46 = vpop.xlane.xlu1 %1053  ;;  %v1170_v47 = vpop.xlane.xlu0 %1169 }
 0x51e   : > { %2022 = vrcp.f32 %v1054_v46 }
 0x51f   : > { %2024 = vrcp.f32 %v1170_v47 }
 0x520   : > { %v2019_v42 = vpop.eup %2018 }
 0x521   : > { %v824_v43 = vmul.f32 %v2019_v42, %v2433_v7  ;;  %v1059_v53 = vpop.permute.xlu1 %1058 }
 0x522   : > { %v1064_v56 = vsel %vm487_vm6, %v1059_v53, 0 }
 0x523   : > { %v825_v44 = vpack.c.bf16 %v824_v43, %v824_v43 }
 0x524   : > { %v2021_v48 = vpop.eup %2020 }
 0x525   : > { %1819 = vmatmul.mubr.msk.bf16.vlgmr.msra.gmra.mrb[16].mxu0 %vm469_vm5, %v825_v44  ;;  %v940_v50 = vmul.f32 %v2021_v48, %v2437_v10  ;;  %v1175_v58 = vpop.permute.xlu1 %1174 }
 0x526   : > { %1830 = vmatprep.mubr.msk.bf16.mxu0 %vm2132_vm1, %v2131_v8  ;;  %v1180_v61 = vsel %vm487_vm6, %v1175_v58, 0 }
 0x527   : > { %v941_v54 = vpack.c.bf16 %v940_v50, %v940_v50 }
 0x528   : > { %v2023_v55 = vpop.eup %2022 }
 0x529   : > { %v1056_v57 = vmul.f32 %v2023_v55, %v2439_v11  ;;  %v2025_v60 = vpop.eup %2024  ;;  %v1291_v63 = vpop.permute.xlu1 %1290 }
 0x52a   : > { %v1172_v62 = vmul.f32 %v2025_v60, %v2443_v13  ;;  %v1296_v3 = vsel %vm487_vm6, %v1291_v63, 0 }
 0x52b   : > { %v1057_v59 = vpack.c.bf16 %v1056_v57, %v1056_v57 }
 0x52c   : > { %v1173_v1 = vpack.c.bf16 %v1172_v62, %v1172_v62 }
 0x535   : > { %v1286_v49 = vpop.xlane.xlu0 %1285 }
 0x536   : > { %2026 = vrcp.f32 %v1286_v49 }
 0x539   : > { %v943_v51 = vpop.permute.xlu0 %942 }
 0x53a   : > { %v948_v52 = vsel %vm487_vm6, %v943_v51, 0 }
 0x53b   : > { %1829 = vmatpush3.bf16.msra.mxu0 %v948_v52  ;;  %v1352_v52 = vsub.s32 4, %v2317_v19 }
 0x53c   : > { %1840 = vmatprep.subr.bf16.mxu0 %v2131_v8 }
 0x53d   : > { %v1353_v53 = vrot.slane %v2323_v21, %v1352_v52 }
 0x53e   : > { %1831 = vmatmul.mubr.msk.bf16.vlgmr.msra.gmra.mrb[20].mxu0 %vm469_vm5, %v941_v54 }
 0x53f   : > { %1841 = vmatpush3.bf16.msra.mxu0 %v1064_v56  ;;  %1842 = vmatprep.mubr.msk.bf16.mxu0 %vm2132_vm1, %v2131_v8 }
 0x540   : > { %1852 = vmatprep.subr.bf16.mxu0 %v2131_v8  ;;  %v2027_v2 = vpop.eup %2026 }
 0x541   : > { %v1288_v4 = vmul.f32 %v2027_v2, %v2452_v22 }
 0x543   : > { %v1289_v5 = vpack.c.bf16 %v1288_v4, %v1288_v4  ;;  %v1987_v4 = vld [vmem:[#allocation3 + $0x8] sm:$0xff]  }
 0x546   : > { %1843 = vmatmul.mubr.msk.bf16.vlgmr.msra.gmra.mrb[24].mxu0 %vm469_vm5, %v1057_v59 }
 0x547   : > { %1853 = vmatpush3.bf16.msra.mxu0 %v1180_v61  ;;  %1854 = vmatprep.mubr.msk.bf16.mxu0 %vm2132_vm1, %v2131_v8 }
 0x548   : > { %1864 = vmatprep.subr.bf16.mxu0 %v2131_v8 }
 0x54e   : > { %1855 = vmatmul.mubr.msk.bf16.vlgmr.msra.gmra.mrb[28].mxu0 %vm469_vm5, %v1173_v1 }
 0x54f   : > { %1865 = vmatpush3.bf16.msra.mxu0 %v1296_v3  ;;  %1866 = vmatprep.mubr.msk.bf16.mxu0 %vm2132_vm1, %v2131_v8  ;;  %v1986_v3 = vld [vmem:[#allocation3] sm:$0xff]  }
 0x550   : > { %1878 = vmatprep.subr.bf16.mxu0 %v2131_v8 }
 0x556   : > { %1867 = vmatmul.mubr.msk.bf16.vlgmr.msra.gmra.mrb[32].mxu0 %vm469_vm5, %v1289_v5  ;;  %v1989_v5 = vld [vmem:[%s2606_s6 + $0x8] sm:$0xff]  }
 0x557   : > { %1882 = vmatprep.mubr.msk.bf16.mxu0 %vm2132_vm1, %v2131_v8  ;;  %1879 = vmatpush3.bf16.msra.mxu0 %v1986_v3 }
 0x558   : > { %1880 = vmatprep.subr.bf16.mxu0 %v2131_v8 }
 0x55b   : > { %1881 = vmatpush3.bf16.msra.mxu0 %v1987_v4 }
 0x5bb   : > { %v525_v6 = vpop.f32.mrb[4].mxu0 }
 0x5bc   : > { %531 = vst.msk [vmem:[#allocation2] sm:$0xff] %vm422_vm4, %v525_v6  ;;  %v1784_v7 = vpop.f32.mrb[5].mxu0 }
 0x5bd   : > { %v528_v9 = vpop.f32.mrb[6].mxu0 }
 0x5be   : > { %v1785_v10 = vpop.f32.mrb[7].mxu0 }
 0x5c3   : > { %v636_v11 = vpop.f32.mrb[8].mxu0 }
 0x5c4   : > { %643 = vrot.lane.b32.xlu1 %v636_v11, %s2156_s18  ;;  %v1796_v12 = vpop.f32.mrb[9].mxu0 }
 0x5c5   : > { %v639_v13 = vpop.f32.mrb[10].mxu0 }
 0x5c6   : > { %v1797_v14 = vpop.f32.mrb[11].mxu0 }
 0x5cb   : > { %v752_v15 = vpop.f32.mrb[12].mxu0 }
 0x5cc   : > { %759 = vrot.lane.b32.xlu1 %v752_v15, %s2157_s21  ;;  %v1808_v16 = vpop.f32.mrb[13].mxu0  ;;  %v1432_v15 = vsub.s32 2, %v2317_v19 }
 0x5cd   : > { %v755_v17 = vpop.f32.mrb[14].mxu0  ;;  %v1437_v16 = vsub.s32 3, %v2317_v19 }
 0x5ce   : > { %v1809_v18 = vpop.f32.mrb[15].mxu0  ;;  %v1433_v17 = vrot.slane %v2323_v21, %v1432_v15 }
 0x5f8   : > { %v868_v20 = vpop.f32.mrb[16].mxu0 }
 0x5f9   : > { %875 = vrot.lane.b32.xlu0 %v868_v20, %s2158_s22  ;;  %v1820_v22 = vpop.f32.mrb[17].mxu0 }
 0x5fa   : > { %v871_v23 = vpop.f32.mrb[18].mxu0  ;;  %v1438_v22 = vrot.slane %v2323_v21, %v1437_v16 }
 0x5fb   : > { %v1821_v24 = vpop.f32.mrb[19].mxu0 }
 0x611   : > { %v984_v25 = vpop.f32.mrb[20].mxu0 }
 0x612   : > { %991 = vrot.lane.b32.xlu1 %v984_v25, %s2159_s23  ;;  %v1832_v26 = vpop.f32.mrb[21].mxu0 }
 0x613   : > { %v987_v27 = vpop.f32.mrb[22].mxu0  ;;  %v1990_v26 = vld [vmem:[%s2606_s6 + $0x10] sm:$0xff]  }
 0x614   : > { %v1833_v28 = vpop.f32.mrb[23].mxu0  ;;  %v1991_v27 = vld [vmem:[%s2606_s6 + $0x18] sm:$0xff]  }
 0x615   : > { %v1707_v28 = vld [vmem:[%s2605_s5] ss:$0 sm:$0xff] }
 0x619   : > { %v1100_v29 = vpop.f32.mrb[24].mxu0 }
 0x61a   : > { %1107 = vrot.lane.b32.xlu0 %v1100_v29, %s2160_s24  ;;  %v1844_v30 = vpop.f32.mrb[25].mxu0  ;;  %s2163_s24 = smov [#allocation6]  }
 0x61b   : > { %v1103_v35 = vpop.f32.mrb[26].mxu0  ;;  %s2064_s25 = sshll.u32 %s2163_s24, 4  ;;  %s2065_s25 = int_to_ptr.vmem [resolvable:$false] %s2064_s25 }
 0x61c   : > { %v1845_v31 = vpop.f32.mrb[27].mxu0  ;;  %s2066_s20 = scalar_lea.vmem %s2065_s25, 256 }
 0x621   : > { %v1216_v34 = vpop.f32.mrb[28].mxu0 }
 0x622   : > { %1223 = vrot.lane.b32.xlu1 %v1216_v34, %s2161_s19  ;;  %v1856_v36 = vpop.f32.mrb[29].mxu0  ;;  %s1682_s19 = sshll.u32 %s309_s17, 3 }
 0x623   : > { %v1219_v37 = vpop.f32.mrb[30].mxu0  ;;  %s311_s12 = scalar_lea.vmem [#allocation6], %s1682_s19 }
 0x624   : > { %v1857_v38 = vpop.f32.mrb[31].mxu0  ;;  %s1605_s13 = sshll.u32 %s311_s12, 4  ;;  %s2559_s13 = int_to_ptr.vmem [resolvable:$true] %s1605_s13 }
 0x625   : > { %s2060_s23 = scalar_lea.vmem %s2559_s13, 128  ;;  %p2067_p2 = scmp.lt.s32.totalorder %s2559_s13, %s2065_s25 }
 0x626   : > { %p2061_p6 = scmp.ne.s32.totalorder %s2559_s13, %s2060_s23  ;;  %p2068_p3 = scmp.lt.s32.totalorder %s2066_s20, %s2060_s23 }
 0x628   : > { %p2062_p10 = pnand %p2061_p6, %p2619_p9  ;;  %p2069_p4 = por %p2068_p3, %p2067_p2 }
 0x629   : > { %v1332_v39 = vpop.f32.mrb[32].mxu0 }
 0x62a   : > { %1339 = vrot.lane.b32.xlu0 %v1332_v39, %s2162_s10  ;;  %v1868_v40 = vpop.f32.mrb[33].mxu0  ;;  %s1717_s10 = sshll.u32 %s2230_s9, 7  ;;  %s1592_s9 = scalar_lea.sflag [#allocation5], %s309_s17 }
 0x62b   : > { %v1335_v41 = vpop.f32.mrb[34].mxu0  ;;  %s2557_s22 = scalar_lea.hbm %s2608_s8, %s1717_s10  ;;  %p2063_p12 = pneg %p2062_p10 }
 0x62c   : > { %v1869_v42 = vpop.f32.mrb[35].mxu0 }
 0x62d   : > { %p2070_p7 = pnand %p2069_p4, %p2063_p12 }
 0x636   : > { %v644_v43 = vpop.permute.xlu1 %643 }
 0x637   : > { %647 = vst.msk [vmem:[#allocation2] sm:$0xff] %vm646_vm7, %v644_v43 }
 0x63e   : > { %v760_v44 = vpop.permute.xlu1 %759 }
 0x63f   : > { %763 = vst.msk [vmem:[#allocation2] sm:$0xff] %vm762_vm8, %v760_v44 }
 0x66b   : > { %v876_v45 = vpop.permute.xlu0 %875 }
 0x66c   : > { %879 = vst.msk [vmem:[#allocation2] sm:$0xff] %vm878_vm9, %v876_v45 }
 0x684   : > { %v992_v46 = vpop.permute.xlu1 %991 }
 0x685   : > { %995 = vst.msk [vmem:[#allocation2] sm:$0xff] %vm994_vm10, %v992_v46 }
 0x68c   : > { %v1108_v47 = vpop.permute.xlu0 %1107 }
 0x68d   : > { %1111 = vst.msk [vmem:[#allocation2] sm:$0xff] %vm1110_vm11, %v1108_v47 }
 0x694   : > { %v1224_v48 = vpop.permute.xlu1 %1223 }
 0x695   : > { %1227 = vst.msk [vmem:[#allocation2] sm:$0xff] %vm1226_vm12, %v1224_v48 }
 0x69c   : > { %v1340_v49 = vpop.permute.xlu0 %1339 }
 0x69d   : > { %1343 = vst.msk [vmem:[#allocation2] sm:$0xff] %vm1342_vm13, %v1340_v49 }
 0x6a4   : > { %v1344_v50 = vld [vmem:[#allocation2] sm:$0xff] }
 0x6a5   : > { %v1345_v51 = vpack.c.bf16 %v1344_v50, %v1344_v50 }
 0x6a7   : > { %1875 = vmatmul.mubr.msk.bf16.vlgmr.msra.gmra.mrb[32].mxu1 %vm319_vm0, %v1345_v51 }
 0x6a8   : > { %1894 = vmatprep.mubr.msk.bf16.mxu1 %vm2132_vm1, %v2131_v8  ;;  %vm1545_vm1 = vcmask 523264  }
 0x77a   : > { %v1403_v54 = vpop.f32.mrb[32].mxu1 }
 0x77b   : > { %v1404_v55 = vadd.f32 %v1403_v54, %v1353_v53  ;;  %v1876_v56 = vpop.f32.mrb[33].mxu1 }
 0x77c   : > { %v1406_v57 = vpop.f32.mrb[34].mxu1 }
 0x77d   : > { %v2519_v58 = vadd.f32 %v1404_v55, %v2297_v0  ;;  %v1877_v59 = vpop.f32.mrb[35].mxu1  ;;  %v1988_v0 = vld [vmem:[%s2606_s6] sm:$0xff]  }
 0x77e   : > { %1887 = vmatpush3.bf16.msra.mxu1 %v1988_v0 }
 0x77f   : > { %v1410_v60 = vsel %vm319_vm0, %v2519_v58, 0.0  ;;  %1888 = vmatprep.subr.bf16.mxu1 %v2131_v8 }
 0x780   : > { %1411 = vadd.xlane.f32.xlu1 %v1410_v60 }
 0x782   : > { %1889 = vmatpush3.bf16.msra.mxu1 %v1989_v5 }
 0x783   : > { %1890 = vmatprep.subr.bf16.mxu1 %v2131_v8 }
 0x786   : > { %1891 = vmatpush3.bf16.msra.mxu1 %v1990_v26 }
 0x787   : > { %1892 = vmatprep.subr.bf16.mxu1 %v2131_v8  ;;  %v1519_v8 = vsub.s32 5, %v2317_v19 }
 0x789   : > { %v1520_v36 = vrot.slane %v2323_v21, %v1519_v8 }
 0x78a   : > { %1893 = vmatpush3.bf16.msra.mxu1 %v1991_v27 }
 0x80d   : > { %v1412_v61 = vpop.xlane.xlu1 %1411 }
 0x80e   : > { %v1413_v62 = vmul.f32 0.03125, %v1412_v61 }
 0x810   : > { %v1414_v63 = vsub.f32 %v2519_v58, %v1413_v62 }
 0x812   : > { %v1415_v1 = vmul.f32 %v1414_v63, %v1414_v63 }
 0x814   : > { %v1416_v2 = vsel %vm319_vm0, %v1415_v1, 0.0 }
 0x815   : > { %1417 = vadd.xlane.f32.xlu0 %v1416_v2 }
 0x8a2   : > { %v1418_v6 = vpop.xlane.xlu0 %1417 }
 0x8a3   : > { %v1419_v7 = vmul.f32 0.032258064, %v1418_v6 }
 0x8a5   : > { %2028 = vrsqrt.f32 %v1419_v7  ;;  %vm1422_vm14 = vcmp.eq.f32.partialorder %v1419_v7, inf  ;;  %v1425_v11 = vand.u32 2147483648, %v1419_v7  ;;  %vm1424_vm15 = vcmp.eq.f32.partialorder %v1419_v7, 0.0 }
 0x8af   : > { %v2029_v9 = vpop.eup %2028 }
 0x8b0   : > { %v1421_v10 = vmul.f32 %v2029_v9, %v1419_v7 }
 0x8b2   : > { %v1423_v12 = vsel %vm1422_vm14, %v1419_v7, %v1421_v10 }
 0x8b3   : > { %v1426_v13 = vsel %vm1424_vm15, %v1425_v11, %v1423_v12 }
 0x8b4   : > { %v1427_v14 = vadd.f32 1e-06, %v1426_v13 }
 0x8b6   : > { %2030 = vrcp.f32 %v1427_v14 }
 0x8c0   : > { %v2031_v18 = vpop.eup %2030 }
 0x8c1   : > { %v1429_v20 = vmul.f32 %v2031_v18, %v1414_v63 }
 0x8c3   : > { %v1434_v23 = vmul.f32 %v1433_v17, %v1429_v20 }
 0x8c5   : > { %v1439_v24 = vadd.f32 %v1438_v22, %v1434_v23 }
 0x8c7   : > { %v1440_v25 = vpack.c.bf16 %v1439_v24, %v1439_v24 }
 0x8c9   : > { %1883 = vmatmul.mubr.msk.bf16.vlgmr.msra.gmra.mrb[36].mxu0 %vm319_vm0, %v1440_v25 }
 0x99c   : > { %v1501_v29 = vpop.f32.mrb[36].mxu0 }
 0x99d   : > { %v1502_v30 = vadd.f32 %v1707_v28, %v1501_v29  ;;  %v1884_v35 = vpop.f32.mrb[37].mxu0 }
 0x99e   : > { %v1504_v31 = vpop.f32.mrb[38].mxu0 }
 0x99f   : > { %v1507_v32 = vmax.f32 %v1502_v30, 0.0  ;;  %v1885_v33 = vpop.f32.mrb[39].mxu0 }
 0x9a1   : > { %v1508_v34 = vpack.c.bf16 %v1507_v32, %v1507_v32 }
 0x9a3   : > { %1895 = vmatmul.mubr.msk.bf16.vlgmr.msra.gmra.mrb[36].mxu1 %vm1545_vm1, %v1508_v34 }
 0xa76   : > { %v1583_v37 = vpop.f32.mrb[36].mxu1 }
 0xa77   : > { %v1584_v38 = vadd.f32 %v1583_v37, %v1520_v36  ;;  %v1896_v39 = vpop.f32.mrb[37].mxu1 }
 0xa78   : > { %v1586_v40 = vpop.f32.mrb[38].mxu1 }
 0xa79   : > { %v1589_v41 = vadd.f32 %v1584_v38, %v2519_v58  ;;  %v1897_v42 = vpop.f32.mrb[39].mxu1 }
 0xa7b   : > { %1590 = vst.msk [vmem:[%s311_s12] sm:$0xff] %vm319_vm0, %v1589_v41 }
 0xa7c   : > { %2073 = shalt.err (!%p2070_p7)
}
 0xa7d   : > { %s2074_s26 = scalar_lea.hbm %s2557_s22, 128  ;;  %s2078_s10 = scalar_lea.hbm %s2608_s8, 256 }
 0xa7e   : > { %p2075_p8 = scmp.ne.s32.totalorder %s2557_s22, %s2074_s26  ;;  %p2079_p1 = scmp.lt.u32.totalorder %s2557_s22, %s2608_s8 }
 0xa7f   : > { %p2080_p0 = scmp.lt.u32.totalorder %s2078_s10, %s2074_s26  ;;  %p2082_p6 = scmp.lt.u32.totalorder %s2074_s26, %s2557_s22 }
 0xa80   : > { %p2076_p11 = pnand %p2075_p8, %p2619_p9 }
 0xa81   : > { %p2081_p5 = por %p2080_p0, %p2079_p1 }
 0xa82   : > { %p2077_p13 = pneg %p2076_p11 }
 0xa83   : > { %p2083_p10 = por %p2082_p6, %p2081_p5 }
 0xa85   : > { %p2084_p12 = pnand %p2083_p10, %p2077_p13 }
 0xa87   : > { %2087 = shalt.err (!%p2084_p12)
}
 0xa88   : > { %1902 = dma.vmem_to_hbm [thread:$0]  (%p2619_p9), %s2559_s13, 128, %s2557_s22, %s1592_s9  }
 0xa89 PF: > { %p1914_p2 = scmp.ge.s32.totalorder %s2126_s30, 2  ;;  %s1617_s21 = sand.u32 1, %s2114_s27  }
 0xa8a   : > { %p2620_p3 = scmp.ne.s32.totalorder %s2613_s16, 0  ;;  %s1618_s23 = scalar_lea.sflag [#allocation5], %s1617_s21 }
 0xa8c   : > { %p1909_p4 = pnand %p1914_p2, %p2620_p3 }
 0xa8e   : > { %2109 = dma.done.wait (!%p1909_p4), %s1618_s23, 128  }
 0xa8f   : > { %2111 = vsyncadd (!%p1909_p4), %s1618_s23, 4294967168  ;;  %p19_p7 = scmp.ge.s32.totalorder %s2234_s11, 4   ;;  %s2621_s27 = smov %s2118_s28 }
 0xa90   : > { %s2622_s28 = smov %s2122_s29  ;;  %s2623_s29 = smov %s2245_s14 }
 0xa91   : > { %s2624_s30 = smov %s2234_s11  ;;  %21 = sbr.rel (!%p19_p7) target bundleno = 4 (0x4), region = 92 }
 0xa98   :  { %1623 = vsyncpa [#allocation4], 1 }
 0xa99   :  { %1625 = vsyncpa [#allocation4 + $0x1], 1 }
 0xa9a   :  { %1626 = vsyncpa [#allocation5], 1 }
 0xa9b   :  { %1628 = vsyncpa [#allocation5 + $0x1], 1 }

</bundles_post_ra>
